<compile_context>
chip_gen: v6e
topology: v6e:2x2x1
jax: 0.10.0
libtpu: 0.0.40
codegen_flags: <defaults>
</compile_context>

<pallas_src>
import functools

import jax
import jax.numpy as jnp
from jax.experimental import pallas as pl
from jax.experimental.pallas import tpu as pltpu

BN_EPS = 1e-5
# Safe on all generations (v5e default scoped is 16 MiB; v7x physical is 64 MiB).
VMEM_LIMIT_BYTES = 32 * 1024 * 1024

# (dy, dx) tap order; tap index t = (dy+1)*3 + (dx+1) = ky*3 + kx.
_TAPS = tuple((dy, dx) for dy in (-1, 0, 1) for dx in (-1, 0, 1))


def _conv3x3_im2col(xflat, w2d, b, mask, taps_ref, W):
    """Zero-padded 3x3 conv on a lane-dense [Cin, HW] slab -> [Cout, HW].

    xflat:    [Cin, HW]      activation slab (lanes = pixels)
    w2d:      [Cout, 9*Cin]  tap-major flattened weights (host-prepared)
    b:        [Cout, 1]      bias
    mask:     [9, HW]        1.0 where the shifted tap is inside the image
    taps_ref: VMEM scratch   [9*Cin, HW] im2col buffer
    Shifts are cheap XLU lane rotations; the implicit zero padding is a single
    precomputed mask multiply per tap.  The contraction runs on the MXU.
    """
    cin, HW = xflat.shape
    for t, (dy, dx) in enumerate(_TAPS):
        if dy == 0 and dx == 0:
            tap = xflat
        else:
            s = dy * W + dx
            # rolled[:, p] == xflat[:, (p + s) mod HW]  (jnp.roll semantics)
            rolled = pltpu.roll(xflat, shift=(-s) % HW, axis=1)
            tap = rolled * mask[t:t + 1, :]
        taps_ref[t * cin:(t + 1) * cin, :] = tap
    return jnp.dot(w2d, taps_ref[...], preferred_element_type=jnp.float32) + b


@functools.partial(jax.jit, static_argnames=("use_act", "stride"))
def double_conv_block(x_nchw, params, use_act=True, stride=1):
    assert stride == 1, "only stride=1 is implemented"

    N, Cin, H, W = x_nchw.shape
    HW = H * W

    w1 = params["w1"].astype(jnp.float32)                    # [Cmid, Cin, 3, 3]
    w2 = params["w2"].astype(jnp.float32)                    # [Cout, Cmid, 3, 3]
    Cmid, Cout = w1.shape[0], w2.shape[0]

    # Host-side 2D weights: W2d[co, t*Cin + ci] = w[co, ci, ky, kx], t = ky*3+kx.
    w1_2d = jnp.transpose(w1.reshape(Cmid, Cin, 9), (0, 2, 1)).reshape(Cmid, 9 * Cin)
    w2_2d = jnp.transpose(w2.reshape(Cout, Cmid, 9), (0, 2, 1)).reshape(Cout, 9 * Cmid)
    b1 = params["b1"].astype(jnp.float32).reshape(Cmid, 1)
    b2 = params["b2"].astype(jnp.float32).reshape(Cout, 1)

    # Precomputed border-validity masks, one row per tap (center row unused).
    pix = jnp.arange(HW, dtype=jnp.int32)
    yy = pix // W
    xx = pix - yy * W
    mask_rows = []
    for dy, dx in _TAPS:
        valid = ((yy + dy) >= 0) & ((yy + dy) < H) & ((xx + dx) >= 0) & ((xx + dx) < W)
        mask_rows.append(valid.astype(jnp.float32))
    mask = jnp.stack(mask_rows, axis=0)                       # [9, HW]

    # NCHW -> (N, C, H*W): metadata-only reshape of a contiguous array.
    x = x_nchw.astype(jnp.float32).reshape(N, Cin, HW)

    cparams = pltpu.CompilerParams(
        dimension_semantics=("parallel",),
        vmem_limit_bytes=VMEM_LIMIT_BYTES,
    )

    def img_spec(C):
        return pl.BlockSpec((1, C, HW), lambda n: (n, 0, 0))

    def full_spec(shape):
        return pl.BlockSpec(shape, lambda n: (0,) * len(shape))

    def stat_spec(C):
        return pl.BlockSpec((1, C, 1), lambda n: (n, 0, 0))

    # ----- pass 1: conv1 -> per-image BN1 partial statistics (stats only) -----
    def conv1_stats_kernel(x_ref, w1_ref, b1_ref, mask_ref,
                           mean_ref, m2_ref, taps1):
        msk = mask_ref[...]
        h = _conv3x3_im2col(x_ref[0], w1_ref[...], b1_ref[...], msk, taps1, W)
        m = jnp.mean(h, axis=1, keepdims=True)                # [Cmid, 1]
        d = h - m
        mean_ref[0] = m
        m2_ref[0] = jnp.sum(d * d, axis=1, keepdims=True)

    mean1p, m2_1p = pl.pallas_call(
        conv1_stats_kernel,
        grid=(N,),
        in_specs=[img_spec(Cin), full_spec((Cmid, 9 * Cin)),
                  full_spec((Cmid, 1)), full_spec((9, HW))],
        out_specs=[stat_spec(Cmid), stat_spec(Cmid)],
        out_shape=[jax.ShapeDtypeStruct((N, Cmid, 1), jnp.float32),
                   jax.ShapeDtypeStruct((N, Cmid, 1), jnp.float32)],
        scratch_shapes=[pltpu.VMEM((9 * Cin, HW), jnp.float32)],
        compiler_params=cparams,
    )(x, w1_2d, b1, mask)

    def bn_fold(mean_p, m2_p, gamma, beta):
        # Chan et al. parallel combination of per-image (mean, centered M2):
        # avoids the E[x^2] - E[x]^2 cancellation.  Biased (train-mode) variance.
        mean_i = mean_p[:, :, 0]                              # [N, C]
        m2_i = m2_p[:, :, 0]                                  # [N, C]
        mu = jnp.mean(mean_i, axis=0)                         # equal per-image counts
        m2 = jnp.sum(m2_i, axis=0) + \
            jnp.float32(HW) * jnp.sum((mean_i - mu[None, :]) ** 2, axis=0)
        var = m2 / jnp.float32(N * HW)
        scale = gamma.astype(jnp.float32) * jax.lax.rsqrt(var + BN_EPS)
        shift = beta.astype(jnp.float32) - mu * scale
        return scale[:, None], shift[:, None]                 # [C, 1] each

    sc1, sh1 = bn_fold(mean1p, m2_1p, params["gamma1"], params["beta1"])

    # -- pass 2: conv1 (recompute) -> BN1 FMA -> ReLU -> conv2 + BN2 partials --
    def conv2_stats_kernel(x_ref, w1_ref, b1_ref, sc1_ref, sh1_ref,
                           w2_ref, b2_ref, mask_ref,
                           h2_ref, mean_ref, m2_ref, taps1, taps2):
        msk = mask_ref[...]
        h1 = _conv3x3_im2col(x_ref[0], w1_ref[...], b1_ref[...], msk, taps1, W)
        a = jnp.maximum(h1 * sc1_ref[...] + sh1_ref[...], 0.0)
        h2 = _conv3x3_im2col(a, w2_ref[...], b2_ref[...], msk, taps2, W)
        h2_ref[0] = h2.astype(h2_ref.dtype)
        m = jnp.mean(h2, axis=1, keepdims=True)               # [Cout, 1]
        d = h2 - m
        mean_ref[0] = m
        m2_ref[0] = jnp.sum(d * d, axis=1, keepdims=True)

    h2, mean2p, m2_2p = pl.pallas_call(
        conv2_stats_kernel,
        grid=(N,),
        in_specs=[img_spec(Cin),
                  full_spec((Cmid, 9 * Cin)), full_spec((Cmid, 1)),
                  full_spec((Cmid, 1)), full_spec((Cmid, 1)),
                  full_spec((Cout, 9 * Cmid)), full_spec((Cout, 1)),
                  full_spec((9, HW))],
        out_specs=[img_spec(Cout), stat_spec(Cout), stat_spec(Cout)],
        out_shape=[jax.ShapeDtypeStruct((N, Cout, HW), jnp.float32),
                   jax.ShapeDtypeStruct((N, Cout, 1), jnp.float32),
                   jax.ShapeDtypeStruct((N, Cout, 1), jnp.float32)],
        scratch_shapes=[pltpu.VMEM((9 * Cin, HW), jnp.float32),
                        pltpu.VMEM((9 * Cmid, HW), jnp.float32)],
        compiler_params=cparams,
    )(x, w1_2d, b1, sc1, sh1, w2_2d, b2, mask)

    sc2, sh2 = bn_fold(mean2p, m2_2p, params["gamma2"], params["beta2"])

    # ----- folded BN2 FMA (+ ReLU if use_act): trivially memory-bound, let XLA
    # fuse it with the final reshape instead of spending a third pallas_call -----
    y = h2 * sc2[None, :, :] + sh2[None, :, :]
    if use_act:
        y = jnp.maximum(y, 0.0)
    return y.reshape(N, Cout, H, W)


def init_params(key, cin, cmid, cout):
    k1, k2, k3, k4 = jax.random.split(key, 4)
    return {
        "w1": jax.random.normal(k1, (cmid, cin, 3, 3), jnp.float32) / jnp.sqrt(9.0 * cin),
        "b1": jax.random.normal(k2, (cmid,), jnp.float32) * 0.1,
        "gamma1": jnp.ones((cmid,), jnp.float32),   # PyTorch BatchNorm default init
        "beta1": jnp.zeros((cmid,), jnp.float32),
        "w2": jax.random.normal(k3, (cout, cmid, 3, 3), jnp.float32) / jnp.sqrt(9.0 * cmid),
        "b2": jax.random.normal(k4, (cout,), jnp.float32) * 0.1,
        "gamma2": jnp.ones((cout,), jnp.float32),
        "beta2": jnp.zeros((cout,), jnp.float32),
    }


def _reference(x, params, use_act=True):
    """Pure-JAX reference matching the PyTorch train-mode forward."""
    def conv(h, w, b):
        out = jax.lax.conv_general_dilated(
            h, w, window_strides=(1, 1), padding=((1, 1), (1, 1)),
            dimension_numbers=("NCHW", "OIHW", "NCHW"))
        return out + b[None, :, None, None]

    def bn(h, gamma, beta):
        mean = jnp.mean(h, axis=(0, 2, 3), keepdims=True)
        var = jnp.mean((h - mean) ** 2, axis=(0, 2, 3), keepdims=True)  # biased
        return (h - mean) * jax.lax.rsqrt(var + BN_EPS) * \
            gamma[None, :, None, None] + beta[None, :, None, None]

    h = jnp.maximum(bn(conv(x, params["w1"], params["b1"]),
                       params["gamma1"], params["beta1"]), 0.0)
    out = bn(conv(h, params["w2"], params["b2"]),
             params["gamma2"], params["beta2"])
    if use_act:
        out = jnp.maximum(out, 0.0)
    return out


if __name__ == "__main__":
    key = jax.random.PRNGKey(0)
    kx, kp = jax.random.split(key)
    N, Cin, H, W = 2, 4, 16, 16
    Cmid, Cout = 16, 8

    x = jax.random.normal(kx, (N, Cin, H, W), jnp.float32)
    params = init_params(kp, Cin, Cmid, Cout)

    out = jax.block_until_ready(double_conv_block(x, params, use_act=True))
    assert out.shape == (N, Cout, H, W), out.shape
    assert bool(jnp.isfinite(out).all())

    ref = _reference(x, params, use_act=True)
    assert bool(jnp.allclose(out, ref, atol=1e-3, rtol=1e-3)), \
        float(jnp.max(jnp.abs(out - ref)))

    print("KERNEL_OK")
</pallas_src>

<mosaic_0001>
module attributes {stable_mosaic.version = 11 : i64} {
  func.func @conv1_stats_kernel(%arg0: i32, %arg1: memref<1x4x256xf32, #tpu.memory_space<vmem>>, %arg2: memref<16x36xf32, #tpu.memory_space<vmem>>, %arg3: memref<16x1xf32, #tpu.memory_space<vmem>>, %arg4: memref<9x256xf32, #tpu.memory_space<vmem>>, %arg5: memref<1x16x1xf32, #tpu.memory_space<vmem>>, %arg6: memref<1x16x1xf32, #tpu.memory_space<vmem>>, %arg7: memref<36x256xf32, #tpu.memory_space<vmem>>) attributes {dimension_semantics = [#tpu.dimension_semantics<parallel>], iteration_bounds = array<i64: 2>, scalar_prefetch = 0 : i64, scratch_operands = 1 : i64, tpu.core_type = #tpu.core_type<tc>, window_params = [{transform_indices = @transform_0, window_bounds = array<i64: 1, 4, 256>}, {pipeline_mode = #tpu.pipeline_mode<synchronous>, transform_indices = @transform_1, window_bounds = array<i64: 16, 36>}, {pipeline_mode = #tpu.pipeline_mode<synchronous>, transform_indices = @transform_2, window_bounds = array<i64: 16, 1>}, {pipeline_mode = #tpu.pipeline_mode<synchronous>, transform_indices = @transform_3, window_bounds = array<i64: 9, 256>}, {transform_indices = @transform_4, window_bounds = array<i64: 1, 16, 1>}, {transform_indices = @transform_5, window_bounds = array<i64: 1, 16, 1>}]} {
    %c0 = arith.constant 0 : index
    %c0_0 = arith.constant 0 : index
    %0 = vector.load %arg4[%c0, %c0_0] : memref<9x256xf32, #tpu.memory_space<vmem>>, vector<9x256xf32>
    %c0_1 = arith.constant 0 : index
    %c0_2 = arith.constant 0 : index
    %c0_3 = arith.constant 0 : index
    %1 = vector.load %arg1[%c0_1, %c0_2, %c0_3] : memref<1x4x256xf32, #tpu.memory_space<vmem>>, vector<1x4x256xf32>
    %2 = vector.shape_cast %1 : vector<1x4x256xf32> to vector<4x256xf32>
    %c0_4 = arith.constant 0 : index
    %c0_5 = arith.constant 0 : index
    %3 = vector.load %arg2[%c0_4, %c0_5] : memref<16x36xf32, #tpu.memory_space<vmem>>, vector<16x36xf32>
    %c0_6 = arith.constant 0 : index
    %c0_7 = arith.constant 0 : index
    %4 = vector.load %arg3[%c0_6, %c0_7] : memref<16x1xf32, #tpu.memory_space<vmem>>, vector<16x1xf32>
    %c17_i32 = arith.constant 17 : i32
    %5 = tpu.dynamic_rotate %2 by %c17_i32 dim 1 : vector<4x256xf32>, i32 -> vector<4x256xf32>
    %6 = vector.extract_strided_slice %0 {offsets = [0, 0], sizes = [1, 256], strides = [1, 1]} : vector<9x256xf32> to vector<1x256xf32>
    %7 = vector.broadcast %6 : vector<1x256xf32> to vector<4x256xf32>
    %8 = arith.mulf %5, %7 : vector<4x256xf32>
    %c0_8 = arith.constant 0 : index
    %c0_9 = arith.constant 0 : index
    %9 = vector.load %arg7[%c0_8, %c0_9] : memref<36x256xf32, #tpu.memory_space<vmem>>, vector<4x256xf32>
    tpu.vector_store %arg7[%c0_8, %c0_9], %8 {strides = array<i32>} : memref<36x256xf32, #tpu.memory_space<vmem>>, vector<4x256xf32>,
    %c16_i32 = arith.constant 16 : i32
    %10 = tpu.dynamic_rotate %2 by %c16_i32 dim 1 : vector<4x256xf32>, i32 -> vector<4x256xf32>
    %11 = vector.extract_strided_slice %0 {offsets = [1, 0], sizes = [1, 256], strides = [1, 1]} : vector<9x256xf32> to vector<1x256xf32>
    %12 = vector.broadcast %11 : vector<1x256xf32> to vector<4x256xf32>
    %13 = arith.mulf %10, %12 : vector<4x256xf32>
    %c4 = arith.constant 4 : index
    %c0_10 = arith.constant 0 : index
    %14 = vector.load %arg7[%c4, %c0_10] : memref<36x256xf32, #tpu.memory_space<vmem>>, vector<4x256xf32>
    tpu.vector_store %arg7[%c4, %c0_10], %13 {strides = array<i32>} : memref<36x256xf32, #tpu.memory_space<vmem>>, vector<4x256xf32>,
    %c15_i32 = arith.constant 15 : i32
    %15 = tpu.dynamic_rotate %2 by %c15_i32 dim 1 : vector<4x256xf32>, i32 -> vector<4x256xf32>
    %16 = vector.extract_strided_slice %0 {offsets = [2, 0], sizes = [1, 256], strides = [1, 1]} : vector<9x256xf32> to vector<1x256xf32>
    %17 = vector.broadcast %16 : vector<1x256xf32> to vector<4x256xf32>
    %18 = arith.mulf %15, %17 : vector<4x256xf32>
    %c8 = arith.constant 8 : index
    %c0_11 = arith.constant 0 : index
    %19 = vector.load %arg7[%c8, %c0_11] : memref<36x256xf32, #tpu.memory_space<vmem>>, vector<4x256xf32>
    tpu.vector_store %arg7[%c8, %c0_11], %18 {strides = array<i32>} : memref<36x256xf32, #tpu.memory_space<vmem>>, vector<4x256xf32>,
    %c1_i32 = arith.constant 1 : i32
    %20 = tpu.dynamic_rotate %2 by %c1_i32 dim 1 : vector<4x256xf32>, i32 -> vector<4x256xf32>
    %21 = vector.extract_strided_slice %0 {offsets = [3, 0], sizes = [1, 256], strides = [1, 1]} : vector<9x256xf32> to vector<1x256xf32>
    %22 = vector.broadcast %21 : vector<1x256xf32> to vector<4x256xf32>
    %23 = arith.mulf %20, %22 : vector<4x256xf32>
    %c12 = arith.constant 12 : index
    %c0_12 = arith.constant 0 : index
    %24 = vector.load %arg7[%c12, %c0_12] : memref<36x256xf32, #tpu.memory_space<vmem>>, vector<4x256xf32>
    tpu.vector_store %arg7[%c12, %c0_12], %23 {strides = array<i32>} : memref<36x256xf32, #tpu.memory_space<vmem>>, vector<4x256xf32>,
    %c16 = arith.constant 16 : index
    %c0_13 = arith.constant 0 : index
    %25 = vector.load %arg7[%c16, %c0_13] : memref<36x256xf32, #tpu.memory_space<vmem>>, vector<4x256xf32>
    tpu.vector_store %arg7[%c16, %c0_13], %2 {strides = array<i32>} : memref<36x256xf32, #tpu.memory_space<vmem>>, vector<4x256xf32>,
    %c255_i32 = arith.constant 255 : i32
    %26 = tpu.dynamic_rotate %2 by %c255_i32 dim 1 : vector<4x256xf32>, i32 -> vector<4x256xf32>
    %27 = vector.extract_strided_slice %0 {offsets = [5, 0], sizes = [1, 256], strides = [1, 1]} : vector<9x256xf32> to vector<1x256xf32>
    %28 = vector.broadcast %27 : vector<1x256xf32> to vector<4x256xf32>
    %29 = arith.mulf %26, %28 : vector<4x256xf32>
    %c20 = arith.constant 20 : index
    %c0_14 = arith.constant 0 : index
    %30 = vector.load %arg7[%c20, %c0_14] : memref<36x256xf32, #tpu.memory_space<vmem>>, vector<4x256xf32>
    tpu.vector_store %arg7[%c20, %c0_14], %29 {strides = array<i32>} : memref<36x256xf32, #tpu.memory_space<vmem>>, vector<4x256xf32>,
    %c241_i32 = arith.constant 241 : i32
    %31 = tpu.dynamic_rotate %2 by %c241_i32 dim 1 : vector<4x256xf32>, i32 -> vector<4x256xf32>
    %32 = vector.extract_strided_slice %0 {offsets = [6, 0], sizes = [1, 256], strides = [1, 1]} : vector<9x256xf32> to vector<1x256xf32>
    %33 = vector.broadcast %32 : vector<1x256xf32> to vector<4x256xf32>
    %34 = arith.mulf %31, %33 : vector<4x256xf32>
    %c24 = arith.constant 24 : index
    %c0_15 = arith.constant 0 : index
    %35 = vector.load %arg7[%c24, %c0_15] : memref<36x256xf32, #tpu.memory_space<vmem>>, vector<4x256xf32>
    tpu.vector_store %arg7[%c24, %c0_15], %34 {strides = array<i32>} : memref<36x256xf32, #tpu.memory_space<vmem>>, vector<4x256xf32>,
    %c240_i32 = arith.constant 240 : i32
    %36 = tpu.dynamic_rotate %2 by %c240_i32 dim 1 : vector<4x256xf32>, i32 -> vector<4x256xf32>
    %37 = vector.extract_strided_slice %0 {offsets = [7, 0], sizes = [1, 256], strides = [1, 1]} : vector<9x256xf32> to vector<1x256xf32>
    %38 = vector.broadcast %37 : vector<1x256xf32> to vector<4x256xf32>
    %39 = arith.mulf %36, %38 : vector<4x256xf32>
    %c28 = arith.constant 28 : index
    %c0_16 = arith.constant 0 : index
    %40 = vector.load %arg7[%c28, %c0_16] : memref<36x256xf32, #tpu.memory_space<vmem>>, vector<4x256xf32>
    tpu.vector_store %arg7[%c28, %c0_16], %39 {strides = array<i32>} : memref<36x256xf32, #tpu.memory_space<vmem>>, vector<4x256xf32>,
    %c239_i32 = arith.constant 239 : i32
    %41 = tpu.dynamic_rotate %2 by %c239_i32 dim 1 : vector<4x256xf32>, i32 -> vector<4x256xf32>
    %42 = vector.extract_strided_slice %0 {offsets = [8, 0], sizes = [1, 256], strides = [1, 1]} : vector<9x256xf32> to vector<1x256xf32>
    %43 = vector.broadcast %42 : vector<1x256xf32> to vector<4x256xf32>
    %44 = arith.mulf %41, %43 : vector<4x256xf32>
    %c32 = arith.constant 32 : index
    %c0_17 = arith.constant 0 : index
    %45 = vector.load %arg7[%c32, %c0_17] : memref<36x256xf32, #tpu.memory_space<vmem>>, vector<4x256xf32>
    tpu.vector_store %arg7[%c32, %c0_17], %44 {strides = array<i32>} : memref<36x256xf32, #tpu.memory_space<vmem>>, vector<4x256xf32>,
    %c0_18 = arith.constant 0 : index
    %c0_19 = arith.constant 0 : index
    %46 = vector.load %arg7[%c0_18, %c0_19] : memref<36x256xf32, #tpu.memory_space<vmem>>, vector<36x256xf32>
    %cst = arith.constant dense<0.000000e+00> : vector<16x256xf32>
    %47 = tpu.matmul %3, %46, %cst {dimension_numbers = #tpu.dot_dimension_numbers<[1], [0], [0], [1], [0, 0, 1, 1], [], []>} : vector<16x36xf32>, vector<36x256xf32>, vector<16x256xf32> -> vector<16x256xf32>
    %48 = vector.broadcast %4 : vector<16x1xf32> to vector<16x256xf32>
    %49 = arith.addf %47, %48 : vector<16x256xf32>
    %cst_20 = arith.constant dense<0.000000e+00> : vector<16xf32>
    %50 = vector.multi_reduction <add>, %49, %cst_20 [1] : vector<16x256xf32> to vector<16xf32>
    %51 = vector.shape_cast %50 : vector<16xf32> to vector<16x1xf32>
    %cst_21 = arith.constant 2.560000e+02 : f32
    %52 = vector.broadcast %cst_21 : f32 to vector<16x1xf32>
    %53 = arith.divf %51, %52 : vector<16x1xf32>
    %54 = vector.broadcast %53 : vector<16x1xf32> to vector<16x256xf32>
    %55 = arith.subf %49, %54 : vector<16x256xf32>
    %c0_22 = arith.constant 0 : index
    %c0_23 = arith.constant 0 : index
    %c0_24 = arith.constant 0 : index
    %56 = vector.load %arg5[%c0_22, %c0_23, %c0_24] : memref<1x16x1xf32, #tpu.memory_space<vmem>>, vector<1x16x1xf32>
    %57 = vector.shape_cast %56 : vector<1x16x1xf32> to vector<16x1xf32>
    %58 = vector.shape_cast %53 : vector<16x1xf32> to vector<1x16x1xf32>
    tpu.vector_store %arg5[%c0_22, %c0_23, %c0_24], %58 {strides = array<i32>} : memref<1x16x1xf32, #tpu.memory_space<vmem>>, vector<1x16x1xf32>,
    %59 = arith.mulf %55, %55 : vector<16x256xf32>
    %cst_25 = arith.constant dense<0.000000e+00> : vector<16xf32>
    %60 = vector.multi_reduction <add>, %59, %cst_25 [1] : vector<16x256xf32> to vector<16xf32>
    %61 = vector.shape_cast %60 : vector<16xf32> to vector<16x1xf32>
    %c0_26 = arith.constant 0 : index
    %c0_27 = arith.constant 0 : index
    %c0_28 = arith.constant 0 : index
    %62 = vector.load %arg6[%c0_26, %c0_27, %c0_28] : memref<1x16x1xf32, #tpu.memory_space<vmem>>, vector<1x16x1xf32>
    %63 = vector.shape_cast %62 : vector<1x16x1xf32> to vector<16x1xf32>
    %64 = vector.shape_cast %61 : vector<16x1xf32> to vector<1x16x1xf32>
    tpu.vector_store %arg6[%c0_26, %c0_27, %c0_28], %64 {strides = array<i32>} : memref<1x16x1xf32, #tpu.memory_space<vmem>>, vector<1x16x1xf32>,
    return
  }
  func.func @transform_0(%arg0: i32) -> (i32, i32, i32) {
    %c0_i32 = arith.constant 0 : i32
    %c0_i32_0 = arith.constant 0 : i32
    %c0_i32_1 = arith.constant 0 : i32
    return %arg0, %c0_i32, %c0_i32_0 : i32, i32, i32
  }
  func.func @transform_1(%arg0: i32) -> (i32, i32) {
    %c0_i32 = arith.constant 0 : i32
    %c0_i32_0 = arith.constant 0 : i32
    %c0_i32_1 = arith.constant 0 : i32
    return %c0_i32, %c0_i32_0 : i32, i32
  }
  func.func @transform_2(%arg0: i32) -> (i32, i32) {
    %c0_i32 = arith.constant 0 : i32
    %c0_i32_0 = arith.constant 0 : i32
    %c0_i32_1 = arith.constant 0 : i32
    return %c0_i32, %c0_i32_0 : i32, i32
  }
  func.func @transform_3(%arg0: i32) -> (i32, i32) {
    %c0_i32 = arith.constant 0 : i32
    %c0_i32_0 = arith.constant 0 : i32
    %c0_i32_1 = arith.constant 0 : i32
    return %c0_i32, %c0_i32_0 : i32, i32
  }
  func.func @transform_4(%arg0: i32) -> (i32, i32, i32) {
    %c0_i32 = arith.constant 0 : i32
    %c0_i32_0 = arith.constant 0 : i32
    %c0_i32_1 = arith.constant 0 : i32
    return %arg0, %c0_i32, %c0_i32_0 : i32, i32, i32
  }
  func.func @transform_5(%arg0: i32) -> (i32, i32, i32) {
    %c0_i32 = arith.constant 0 : i32
    %c0_i32_0 = arith.constant 0 : i32
    %c0_i32_1 = arith.constant 0 : i32
    return %arg0, %c0_i32, %c0_i32_0 : i32, i32, i32
  }
}

module attributes {stable_mosaic.version = 11 : i64} {
  func.func @conv2_stats_kernel(%arg0: i32, %arg1: memref<1x4x256xf32, #tpu.memory_space<vmem>>, %arg2: memref<16x36xf32, #tpu.memory_space<vmem>>, %arg3: memref<16x1xf32, #tpu.memory_space<vmem>>, %arg4: memref<16x1xf32, #tpu.memory_space<vmem>>, %arg5: memref<16x1xf32, #tpu.memory_space<vmem>>, %arg6: memref<8x144xf32, #tpu.memory_space<vmem>>, %arg7: memref<8x1xf32, #tpu.memory_space<vmem>>, %arg8: memref<9x256xf32, #tpu.memory_space<vmem>>, %arg9: memref<1x8x256xf32, #tpu.memory_space<vmem>>, %arg10: memref<1x8x1xf32, #tpu.memory_space<vmem>>, %arg11: memref<1x8x1xf32, #tpu.memory_space<vmem>>, %arg12: memref<36x256xf32, #tpu.memory_space<vmem>>, %arg13: memref<144x256xf32, #tpu.memory_space<vmem>>) attributes {dimension_semantics = [#tpu.dimension_semantics<parallel>], iteration_bounds = array<i64: 2>, scalar_prefetch = 0 : i64, scratch_operands = 2 : i64, tpu.core_type = #tpu.core_type<tc>, window_params = [{transform_indices = @transform_0, window_bounds = array<i64: 1, 4, 256>}, {pipeline_mode = #tpu.pipeline_mode<synchronous>, transform_indices = @transform_1, window_bounds = array<i64: 16, 36>}, {pipeline_mode = #tpu.pipeline_mode<synchronous>, transform_indices = @transform_2, window_bounds = array<i64: 16, 1>}, {pipeline_mode = #tpu.pipeline_mode<synchronous>, transform_indices = @transform_3, window_bounds = array<i64: 16, 1>}, {pipeline_mode = #tpu.pipeline_mode<synchronous>, transform_indices = @transform_4, window_bounds = array<i64: 16, 1>}, {pipeline_mode = #tpu.pipeline_mode<synchronous>, transform_indices = @transform_5, window_bounds = array<i64: 8, 144>}, {pipeline_mode = #tpu.pipeline_mode<synchronous>, transform_indices = @transform_6, window_bounds = array<i64: 8, 1>}, {pipeline_mode = #tpu.pipeline_mode<synchronous>, transform_indices = @transform_7, window_bounds = array<i64: 9, 256>}, {transform_indices = @transform_8, window_bounds = array<i64: 1, 8, 256>}, {transform_indices = @transform_9, window_bounds = array<i64: 1, 8, 1>}, {transform_indices = @transform_10, window_bounds = array<i64: 1, 8, 1>}]} {
    %c0 = arith.constant 0 : index
    %c0_0 = arith.constant 0 : index
    %0 = vector.load %arg8[%c0, %c0_0] : memref<9x256xf32, #tpu.memory_space<vmem>>, vector<9x256xf32>
    %c0_1 = arith.constant 0 : index
    %c0_2 = arith.constant 0 : index
    %c0_3 = arith.constant 0 : index
    %1 = vector.load %arg1[%c0_1, %c0_2, %c0_3] : memref<1x4x256xf32, #tpu.memory_space<vmem>>, vector<1x4x256xf32>
    %2 = vector.shape_cast %1 : vector<1x4x256xf32> to vector<4x256xf32>
    %c0_4 = arith.constant 0 : index
    %c0_5 = arith.constant 0 : index
    %3 = vector.load %arg2[%c0_4, %c0_5] : memref<16x36xf32, #tpu.memory_space<vmem>>, vector<16x36xf32>
    %c0_6 = arith.constant 0 : index
    %c0_7 = arith.constant 0 : index
    %4 = vector.load %arg3[%c0_6, %c0_7] : memref<16x1xf32, #tpu.memory_space<vmem>>, vector<16x1xf32>
    %c17_i32 = arith.constant 17 : i32
    %5 = tpu.dynamic_rotate %2 by %c17_i32 dim 1 : vector<4x256xf32>, i32 -> vector<4x256xf32>
    %6 = vector.extract_strided_slice %0 {offsets = [0, 0], sizes = [1, 256], strides = [1, 1]} : vector<9x256xf32> to vector<1x256xf32>
    %7 = vector.broadcast %6 : vector<1x256xf32> to vector<4x256xf32>
    %8 = arith.mulf %5, %7 : vector<4x256xf32>
    %c0_8 = arith.constant 0 : index
    %c0_9 = arith.constant 0 : index
    %9 = vector.load %arg12[%c0_8, %c0_9] : memref<36x256xf32, #tpu.memory_space<vmem>>, vector<4x256xf32>
    tpu.vector_store %arg12[%c0_8, %c0_9], %8 {strides = array<i32>} : memref<36x256xf32, #tpu.memory_space<vmem>>, vector<4x256xf32>,
    %c16_i32 = arith.constant 16 : i32
    %10 = tpu.dynamic_rotate %2 by %c16_i32 dim 1 : vector<4x256xf32>, i32 -> vector<4x256xf32>
    %11 = vector.extract_strided_slice %0 {offsets = [1, 0], sizes = [1, 256], strides = [1, 1]} : vector<9x256xf32> to vector<1x256xf32>
    %12 = vector.broadcast %11 : vector<1x256xf32> to vector<4x256xf32>
    %13 = arith.mulf %10, %12 : vector<4x256xf32>
    %c4 = arith.constant 4 : index
    %c0_10 = arith.constant 0 : index
    %14 = vector.load %arg12[%c4, %c0_10] : memref<36x256xf32, #tpu.memory_space<vmem>>, vector<4x256xf32>
    tpu.vector_store %arg12[%c4, %c0_10], %13 {strides = array<i32>} : memref<36x256xf32, #tpu.memory_space<vmem>>, vector<4x256xf32>,
    %c15_i32 = arith.constant 15 : i32
    %15 = tpu.dynamic_rotate %2 by %c15_i32 dim 1 : vector<4x256xf32>, i32 -> vector<4x256xf32>
    %16 = vector.extract_strided_slice %0 {offsets = [2, 0], sizes = [1, 256], strides = [1, 1]} : vector<9x256xf32> to vector<1x256xf32>
    %17 = vector.broadcast %16 : vector<1x256xf32> to vector<4x256xf32>
    %18 = arith.mulf %15, %17 : vector<4x256xf32>
    %c8 = arith.constant 8 : index
    %c0_11 = arith.constant 0 : index
    %19 = vector.load %arg12[%c8, %c0_11] : memref<36x256xf32, #tpu.memory_space<vmem>>, vector<4x256xf32>
    tpu.vector_store %arg12[%c8, %c0_11], %18 {strides = array<i32>} : memref<36x256xf32, #tpu.memory_space<vmem>>, vector<4x256xf32>,
    %c1_i32 = arith.constant 1 : i32
    %20 = tpu.dynamic_rotate %2 by %c1_i32 dim 1 : vector<4x256xf32>, i32 -> vector<4x256xf32>
    %21 = vector.extract_strided_slice %0 {offsets = [3, 0], sizes = [1, 256], strides = [1, 1]} : vector<9x256xf32> to vector<1x256xf32>
    %22 = vector.broadcast %21 : vector<1x256xf32> to vector<4x256xf32>
    %23 = arith.mulf %20, %22 : vector<4x256xf32>
    %c12 = arith.constant 12 : index
    %c0_12 = arith.constant 0 : index
    %24 = vector.load %arg12[%c12, %c0_12] : memref<36x256xf32, #tpu.memory_space<vmem>>, vector<4x256xf32>
    tpu.vector_store %arg12[%c12, %c0_12], %23 {strides = array<i32>} : memref<36x256xf32, #tpu.memory_space<vmem>>, vector<4x256xf32>,
    %c16 = arith.constant 16 : index
    %c0_13 = arith.constant 0 : index
    %25 = vector.load %arg12[%c16, %c0_13] : memref<36x256xf32, #tpu.memory_space<vmem>>, vector<4x256xf32>
    tpu.vector_store %arg12[%c16, %c0_13], %2 {strides = array<i32>} : memref<36x256xf32, #tpu.memory_space<vmem>>, vector<4x256xf32>,
    %c255_i32 = arith.constant 255 : i32
    %26 = tpu.dynamic_rotate %2 by %c255_i32 dim 1 : vector<4x256xf32>, i32 -> vector<4x256xf32>
    %27 = vector.extract_strided_slice %0 {offsets = [5, 0], sizes = [1, 256], strides = [1, 1]} : vector<9x256xf32> to vector<1x256xf32>
    %28 = vector.broadcast %27 : vector<1x256xf32> to vector<4x256xf32>
    %29 = arith.mulf %26, %28 : vector<4x256xf32>
    %c20 = arith.constant 20 : index
    %c0_14 = arith.constant 0 : index
    %30 = vector.load %arg12[%c20, %c0_14] : memref<36x256xf32, #tpu.memory_space<vmem>>, vector<4x256xf32>
    tpu.vector_store %arg12[%c20, %c0_14], %29 {strides = array<i32>} : memref<36x256xf32, #tpu.memory_space<vmem>>, vector<4x256xf32>,
    %c241_i32 = arith.constant 241 : i32
    %31 = tpu.dynamic_rotate %2 by %c241_i32 dim 1 : vector<4x256xf32>, i32 -> vector<4x256xf32>
    %32 = vector.extract_strided_slice %0 {offsets = [6, 0], sizes = [1, 256], strides = [1, 1]} : vector<9x256xf32> to vector<1x256xf32>
    %33 = vector.broadcast %32 : vector<1x256xf32> to vector<4x256xf32>
    %34 = arith.mulf %31, %33 : vector<4x256xf32>
    %c24 = arith.constant 24 : index
    %c0_15 = arith.constant 0 : index
    %35 = vector.load %arg12[%c24, %c0_15] : memref<36x256xf32, #tpu.memory_space<vmem>>, vector<4x256xf32>
    tpu.vector_store %arg12[%c24, %c0_15], %34 {strides = array<i32>} : memref<36x256xf32, #tpu.memory_space<vmem>>, vector<4x256xf32>,
    %c240_i32 = arith.constant 240 : i32
    %36 = tpu.dynamic_rotate %2 by %c240_i32 dim 1 : vector<4x256xf32>, i32 -> vector<4x256xf32>
    %37 = vector.extract_strided_slice %0 {offsets = [7, 0], sizes = [1, 256], strides = [1, 1]} : vector<9x256xf32> to vector<1x256xf32>
    %38 = vector.broadcast %37 : vector<1x256xf32> to vector<4x256xf32>
    %39 = arith.mulf %36, %38 : vector<4x256xf32>
    %c28 = arith.constant 28 : index
    %c0_16 = arith.constant 0 : index
    %40 = vector.load %arg12[%c28, %c0_16] : memref<36x256xf32, #tpu.memory_space<vmem>>, vector<4x256xf32>
    tpu.vector_store %arg12[%c28, %c0_16], %39 {strides = array<i32>} : memref<36x256xf32, #tpu.memory_space<vmem>>, vector<4x256xf32>,
    %c239_i32 = arith.constant 239 : i32
    %41 = tpu.dynamic_rotate %2 by %c239_i32 dim 1 : vector<4x256xf32>, i32 -> vector<4x256xf32>
    %42 = vector.extract_strided_slice %0 {offsets = [8, 0], sizes = [1, 256], strides = [1, 1]} : vector<9x256xf32> to vector<1x256xf32>
    %43 = vector.broadcast %42 : vector<1x256xf32> to vector<4x256xf32>
    %44 = arith.mulf %41, %43 : vector<4x256xf32>
    %c32 = arith.constant 32 : index
    %c0_17 = arith.constant 0 : index
    %45 = vector.load %arg12[%c32, %c0_17] : memref<36x256xf32, #tpu.memory_space<vmem>>, vector<4x256xf32>
    tpu.vector_store %arg12[%c32, %c0_17], %44 {strides = array<i32>} : memref<36x256xf32, #tpu.memory_space<vmem>>, vector<4x256xf32>,
    %c0_18 = arith.constant 0 : index
    %c0_19 = arith.constant 0 : index
    %46 = vector.load %arg12[%c0_18, %c0_19] : memref<36x256xf32, #tpu.memory_space<vmem>>, vector<36x256xf32>
    %cst = arith.constant dense<0.000000e+00> : vector<16x256xf32>
    %47 = tpu.matmul %3, %46, %cst {dimension_numbers = #tpu.dot_dimension_numbers<[1], [0], [0], [1], [0, 0, 1, 1], [], []>} : vector<16x36xf32>, vector<36x256xf32>, vector<16x256xf32> -> vector<16x256xf32>
    %48 = vector.broadcast %4 : vector<16x1xf32> to vector<16x256xf32>
    %49 = arith.addf %47, %48 : vector<16x256xf32>
    %c0_20 = arith.constant 0 : index
    %c0_21 = arith.constant 0 : index
    %50 = vector.load %arg4[%c0_20, %c0_21] : memref<16x1xf32, #tpu.memory_space<vmem>>, vector<16x1xf32>
    %51 = vector.broadcast %50 : vector<16x1xf32> to vector<16x256xf32>
    %52 = arith.mulf %49, %51 : vector<16x256xf32>
    %c0_22 = arith.constant 0 : index
    %c0_23 = arith.constant 0 : index
    %53 = vector.load %arg5[%c0_22, %c0_23] : memref<16x1xf32, #tpu.memory_space<vmem>>, vector<16x1xf32>
    %54 = vector.broadcast %53 : vector<16x1xf32> to vector<16x256xf32>
    %55 = arith.addf %52, %54 : vector<16x256xf32>
    %cst_24 = arith.constant 0.000000e+00 : f32
    %56 = vector.broadcast %cst_24 : f32 to vector<16x256xf32>
    %57 = arith.maximumf %55, %56 : vector<16x256xf32>
    %c0_25 = arith.constant 0 : index
    %c0_26 = arith.constant 0 : index
    %58 = vector.load %arg6[%c0_25, %c0_26] : memref<8x144xf32, #tpu.memory_space<vmem>>, vector<8x144xf32>
    %c0_27 = arith.constant 0 : index
    %c0_28 = arith.constant 0 : index
    %59 = vector.load %arg7[%c0_27, %c0_28] : memref<8x1xf32, #tpu.memory_space<vmem>>, vector<8x1xf32>
    %c17_i32_29 = arith.constant 17 : i32
    %60 = tpu.dynamic_rotate %57 by %c17_i32_29 dim 1 : vector<16x256xf32>, i32 -> vector<16x256xf32>
    %61 = vector.extract_strided_slice %0 {offsets = [0, 0], sizes = [1, 256], strides = [1, 1]} : vector<9x256xf32> to vector<1x256xf32>
    %62 = vector.broadcast %61 : vector<1x256xf32> to vector<16x256xf32>
    %63 = arith.mulf %60, %62 : vector<16x256xf32>
    %c0_30 = arith.constant 0 : index
    %c0_31 = arith.constant 0 : index
    %64 = vector.load %arg13[%c0_30, %c0_31] : memref<144x256xf32, #tpu.memory_space<vmem>>, vector<16x256xf32>
    tpu.vector_store %arg13[%c0_30, %c0_31], %63 {strides = array<i32>} : memref<144x256xf32, #tpu.memory_space<vmem>>, vector<16x256xf32>,
    %c16_i32_32 = arith.constant 16 : i32
    %65 = tpu.dynamic_rotate %57 by %c16_i32_32 dim 1 : vector<16x256xf32>, i32 -> vector<16x256xf32>
    %66 = vector.extract_strided_slice %0 {offsets = [1, 0], sizes = [1, 256], strides = [1, 1]} : vector<9x256xf32> to vector<1x256xf32>
    %67 = vector.broadcast %66 : vector<1x256xf32> to vector<16x256xf32>
    %68 = arith.mulf %65, %67 : vector<16x256xf32>
    %c16_33 = arith.constant 16 : index
    %c0_34 = arith.constant 0 : index
    %69 = vector.load %arg13[%c16_33, %c0_34] : memref<144x256xf32, #tpu.memory_space<vmem>>, vector<16x256xf32>
    tpu.vector_store %arg13[%c16_33, %c0_34], %68 {strides = array<i32>} : memref<144x256xf32, #tpu.memory_space<vmem>>, vector<16x256xf32>,
    %c15_i32_35 = arith.constant 15 : i32
    %70 = tpu.dynamic_rotate %57 by %c15_i32_35 dim 1 : vector<16x256xf32>, i32 -> vector<16x256xf32>
    %71 = vector.extract_strided_slice %0 {offsets = [2, 0], sizes = [1, 256], strides = [1, 1]} : vector<9x256xf32> to vector<1x256xf32>
    %72 = vector.broadcast %71 : vector<1x256xf32> to vector<16x256xf32>
    %73 = arith.mulf %70, %72 : vector<16x256xf32>
    %c32_36 = arith.constant 32 : index
    %c0_37 = arith.constant 0 : index
    %74 = vector.load %arg13[%c32_36, %c0_37] : memref<144x256xf32, #tpu.memory_space<vmem>>, vector<16x256xf32>
    tpu.vector_store %arg13[%c32_36, %c0_37], %73 {strides = array<i32>} : memref<144x256xf32, #tpu.memory_space<vmem>>, vector<16x256xf32>,
    %c1_i32_38 = arith.constant 1 : i32
    %75 = tpu.dynamic_rotate %57 by %c1_i32_38 dim 1 : vector<16x256xf32>, i32 -> vector<16x256xf32>
    %76 = vector.extract_strided_slice %0 {offsets = [3, 0], sizes = [1, 256], strides = [1, 1]} : vector<9x256xf32> to vector<1x256xf32>
    %77 = vector.broadcast %76 : vector<1x256xf32> to vector<16x256xf32>
    %78 = arith.mulf %75, %77 : vector<16x256xf32>
    %c48 = arith.constant 48 : index
    %c0_39 = arith.constant 0 : index
    %79 = vector.load %arg13[%c48, %c0_39] : memref<144x256xf32, #tpu.memory_space<vmem>>, vector<16x256xf32>
    tpu.vector_store %arg13[%c48, %c0_39], %78 {strides = array<i32>} : memref<144x256xf32, #tpu.memory_space<vmem>>, vector<16x256xf32>,
    %c64 = arith.constant 64 : index
    %c0_40 = arith.constant 0 : index
    %80 = vector.load %arg13[%c64, %c0_40] : memref<144x256xf32, #tpu.memory_space<vmem>>, vector<16x256xf32>
    tpu.vector_store %arg13[%c64, %c0_40], %57 {strides = array<i32>} : memref<144x256xf32, #tpu.memory_space<vmem>>, vector<16x256xf32>,
    %c255_i32_41 = arith.constant 255 : i32
    %81 = tpu.dynamic_rotate %57 by %c255_i32_41 dim 1 : vector<16x256xf32>, i32 -> vector<16x256xf32>
    %82 = vector.extract_strided_slice %0 {offsets = [5, 0], sizes = [1, 256], strides = [1, 1]} : vector<9x256xf32> to vector<1x256xf32>
    %83 = vector.broadcast %82 : vector<1x256xf32> to vector<16x256xf32>
    %84 = arith.mulf %81, %83 : vector<16x256xf32>
    %c80 = arith.constant 80 : index
    %c0_42 = arith.constant 0 : index
    %85 = vector.load %arg13[%c80, %c0_42] : memref<144x256xf32, #tpu.memory_space<vmem>>, vector<16x256xf32>
    tpu.vector_store %arg13[%c80, %c0_42], %84 {strides = array<i32>} : memref<144x256xf32, #tpu.memory_space<vmem>>, vector<16x256xf32>,
    %c241_i32_43 = arith.constant 241 : i32
    %86 = tpu.dynamic_rotate %57 by %c241_i32_43 dim 1 : vector<16x256xf32>, i32 -> vector<16x256xf32>
    %87 = vector.extract_strided_slice %0 {offsets = [6, 0], sizes = [1, 256], strides = [1, 1]} : vector<9x256xf32> to vector<1x256xf32>
    %88 = vector.broadcast %87 : vector<1x256xf32> to vector<16x256xf32>
    %89 = arith.mulf %86, %88 : vector<16x256xf32>
    %c96 = arith.constant 96 : index
    %c0_44 = arith.constant 0 : index
    %90 = vector.load %arg13[%c96, %c0_44] : memref<144x256xf32, #tpu.memory_space<vmem>>, vector<16x256xf32>
    tpu.vector_store %arg13[%c96, %c0_44], %89 {strides = array<i32>} : memref<144x256xf32, #tpu.memory_space<vmem>>, vector<16x256xf32>,
    %c240_i32_45 = arith.constant 240 : i32
    %91 = tpu.dynamic_rotate %57 by %c240_i32_45 dim 1 : vector<16x256xf32>, i32 -> vector<16x256xf32>
    %92 = vector.extract_strided_slice %0 {offsets = [7, 0], sizes = [1, 256], strides = [1, 1]} : vector<9x256xf32> to vector<1x256xf32>
    %93 = vector.broadcast %92 : vector<1x256xf32> to vector<16x256xf32>
    %94 = arith.mulf %91, %93 : vector<16x256xf32>
    %c112 = arith.constant 112 : index
    %c0_46 = arith.constant 0 : index
    %95 = vector.load %arg13[%c112, %c0_46] : memref<144x256xf32, #tpu.memory_space<vmem>>, vector<16x256xf32>
    tpu.vector_store %arg13[%c112, %c0_46], %94 {strides = array<i32>} : memref<144x256xf32, #tpu.memory_space<vmem>>, vector<16x256xf32>,
    %c239_i32_47 = arith.constant 239 : i32
    %96 = tpu.dynamic_rotate %57 by %c239_i32_47 dim 1 : vector<16x256xf32>, i32 -> vector<16x256xf32>
    %97 = vector.extract_strided_slice %0 {offsets = [8, 0], sizes = [1, 256], strides = [1, 1]} : vector<9x256xf32> to vector<1x256xf32>
    %98 = vector.broadcast %97 : vector<1x256xf32> to vector<16x256xf32>
    %99 = arith.mulf %96, %98 : vector<16x256xf32>
    %c128 = arith.constant 128 : index
    %c0_48 = arith.constant 0 : index
    %100 = vector.load %arg13[%c128, %c0_48] : memref<144x256xf32, #tpu.memory_space<vmem>>, vector<16x256xf32>
    tpu.vector_store %arg13[%c128, %c0_48], %99 {strides = array<i32>} : memref<144x256xf32, #tpu.memory_space<vmem>>, vector<16x256xf32>,
    %c0_49 = arith.constant 0 : index
    %c0_50 = arith.constant 0 : index
    %101 = vector.load %arg13[%c0_49, %c0_50] : memref<144x256xf32, #tpu.memory_space<vmem>>, vector<144x256xf32>
    %cst_51 = arith.constant dense<0.000000e+00> : vector<8x256xf32>
    %102 = tpu.matmul %58, %101, %cst_51 {dimension_numbers = #tpu.dot_dimension_numbers<[1], [0], [0], [1], [0, 0, 1, 1], [], []>} : vector<8x144xf32>, vector<144x256xf32>, vector<8x256xf32> -> vector<8x256xf32>
    %103 = vector.broadcast %59 : vector<8x1xf32> to vector<8x256xf32>
    %104 = arith.addf %102, %103 : vector<8x256xf32>
    %c0_52 = arith.constant 0 : index
    %c0_53 = arith.constant 0 : index
    %c0_54 = arith.constant 0 : index
    %105 = vector.load %arg9[%c0_52, %c0_53, %c0_54] : memref<1x8x256xf32, #tpu.memory_space<vmem>>, vector<1x8x256xf32>
    %106 = vector.shape_cast %105 : vector<1x8x256xf32> to vector<8x256xf32>
    %107 = vector.shape_cast %104 : vector<8x256xf32> to vector<1x8x256xf32>
    tpu.vector_store %arg9[%c0_52, %c0_53, %c0_54], %107 {strides = array<i32>} : memref<1x8x256xf32, #tpu.memory_space<vmem>>, vector<1x8x256xf32>,
    %cst_55 = arith.constant dense<0.000000e+00> : vector<8xf32>
    %108 = vector.multi_reduction <add>, %104, %cst_55 [1] : vector<8x256xf32> to vector<8xf32>
    %109 = vector.shape_cast %108 : vector<8xf32> to vector<8x1xf32>
    %cst_56 = arith.constant 2.560000e+02 : f32
    %110 = vector.broadcast %cst_56 : f32 to vector<8x1xf32>
    %111 = arith.divf %109, %110 : vector<8x1xf32>
    %112 = vector.broadcast %111 : vector<8x1xf32> to vector<8x256xf32>
    %113 = arith.subf %104, %112 : vector<8x256xf32>
    %c0_57 = arith.constant 0 : index
    %c0_58 = arith.constant 0 : index
    %c0_59 = arith.constant 0 : index
    %114 = vector.load %arg10[%c0_57, %c0_58, %c0_59] : memref<1x8x1xf32, #tpu.memory_space<vmem>>, vector<1x8x1xf32>
    %115 = vector.shape_cast %114 : vector<1x8x1xf32> to vector<8x1xf32>
    %116 = vector.shape_cast %111 : vector<8x1xf32> to vector<1x8x1xf32>
    tpu.vector_store %arg10[%c0_57, %c0_58, %c0_59], %116 {strides = array<i32>} : memref<1x8x1xf32, #tpu.memory_space<vmem>>, vector<1x8x1xf32>,
    %117 = arith.mulf %113, %113 : vector<8x256xf32>
    %cst_60 = arith.constant dense<0.000000e+00> : vector<8xf32>
    %118 = vector.multi_reduction <add>, %117, %cst_60 [1] : vector<8x256xf32> to vector<8xf32>
    %119 = vector.shape_cast %118 : vector<8xf32> to vector<8x1xf32>
    %c0_61 = arith.constant 0 : index
    %c0_62 = arith.constant 0 : index
    %c0_63 = arith.constant 0 : index
    %120 = vector.load %arg11[%c0_61, %c0_62, %c0_63] : memref<1x8x1xf32, #tpu.memory_space<vmem>>, vector<1x8x1xf32>
    %121 = vector.shape_cast %120 : vector<1x8x1xf32> to vector<8x1xf32>
    %122 = vector.shape_cast %119 : vector<8x1xf32> to vector<1x8x1xf32>
    tpu.vector_store %arg11[%c0_61, %c0_62, %c0_63], %122 {strides = array<i32>} : memref<1x8x1xf32, #tpu.memory_space<vmem>>, vector<1x8x1xf32>,
    return
  }
  func.func @transform_0(%arg0: i32) -> (i32, i32, i32) {
    %c0_i32 = arith.constant 0 : i32
    %c0_i32_0 = arith.constant 0 : i32
    %c0_i32_1 = arith.constant 0 : i32
    return %arg0, %c0_i32, %c0_i32_0 : i32, i32, i32
  }
  func.func @transform_1(%arg0: i32) -> (i32, i32) {
    %c0_i32 = arith.constant 0 : i32
    %c0_i32_0 = arith.constant 0 : i32
    %c0_i32_1 = arith.constant 0 : i32
    return %c0_i32, %c0_i32_0 : i32, i32
  }
  func.func @transform_2(%arg0: i32) -> (i32, i32) {
    %c0_i32 = arith.constant 0 : i32
    %c0_i32_0 = arith.constant 0 : i32
    %c0_i32_1 = arith.constant 0 : i32
    return %c0_i32, %c0_i32_0 : i32, i32
  }
  func.func @transform_3(%arg0: i32) -> (i32, i32) {
    %c0_i32 = arith.constant 0 : i32
    %c0_i32_0 = arith.constant 0 : i32
    %c0_i32_1 = arith.constant 0 : i32
    return %c0_i32, %c0_i32_0 : i32, i32
  }
  func.func @transform_4(%arg0: i32) -> (i32, i32) {
    %c0_i32 = arith.constant 0 : i32
    %c0_i32_0 = arith.constant 0 : i32
    %c0_i32_1 = arith.constant 0 : i32
    return %c0_i32, %c0_i32_0 : i32, i32
  }
  func.func @transform_5(%arg0: i32) -> (i32, i32) {
    %c0_i32 = arith.constant 0 : i32
    %c0_i32_0 = arith.constant 0 : i32
    %c0_i32_1 = arith.constant 0 : i32
    return %c0_i32, %c0_i32_0 : i32, i32
  }
  func.func @transform_6(%arg0: i32) -> (i32, i32) {
    %c0_i32 = arith.constant 0 : i32
    %c0_i32_0 = arith.constant 0 : i32
    %c0_i32_1 = arith.constant 0 : i32
    return %c0_i32, %c0_i32_0 : i32, i32
  }
  func.func @transform_7(%arg0: i32) -> (i32, i32) {
    %c0_i32 = arith.constant 0 : i32
    %c0_i32_0 = arith.constant 0 : i32
    %c0_i32_1 = arith.constant 0 : i32
    return %c0_i32, %c0_i32_0 : i32, i32
  }
  func.func @transform_8(%arg0: i32) -> (i32, i32, i32) {
    %c0_i32 = arith.constant 0 : i32
    %c0_i32_0 = arith.constant 0 : i32
    %c0_i32_1 = arith.constant 0 : i32
    return %arg0, %c0_i32, %c0_i32_0 : i32, i32, i32
  }
  func.func @transform_9(%arg0: i32) -> (i32, i32, i32) {
    %c0_i32 = arith.constant 0 : i32
    %c0_i32_0 = arith.constant 0 : i32
    %c0_i32_1 = arith.constant 0 : i32
    return %arg0, %c0_i32, %c0_i32_0 : i32, i32, i32
  }
  func.func @transform_10(%arg0: i32) -> (i32, i32, i32) {
    %c0_i32 = arith.constant 0 : i32
    %c0_i32_0 = arith.constant 0 : i32
    %c0_i32_1 = arith.constant 0 : i32
    return %arg0, %c0_i32, %c0_i32_0 : i32, i32, i32
  }
}

</mosaic_0001>

<bundles_post_ra>
// kernel: double_conv_block.2
= control target key start
LH: loop header
LB: loop body
LE: loop exit
PB: predicated region body
PF: predicated region fallthrough
CT: control target
= control target key end

     0   :  { %s758_s18 = smov 0   ;;  %s871_s0 = inlined_call_operand.vmem [shape: f32[2,4,256], index: 0, kind: input, shape index: {}]   ;;  %s872_s1 = inlined_call_operand.vmem [shape: f32[16,36], index: 1, kind: input, shape index: {}]   ;;  %s873_s2 = inlined_call_operand.vmem [shape: f32[16,1], index: 2, kind: input, shape index: {}]   ;;  %s874_s3 = inlined_call_operand.vmem [shape: f32[9,256], index: 3, kind: input, shape index: {}]   ;;  %s875_s4 = inlined_call_operand.vmem [shape: f32[2,16,1], index: 4, kind: output, shape index: {0}]   ;;  %s876_s5 = inlined_call_operand.vmem [shape: f32[2,16,1], index: 5, kind: output, shape index: {1}]  }
   0x1 LB: > { %s657_s19 = sadd.s32 4294967295, %s716_s18   ;;  %p661_p0 = scmp.ge.s32.totalorder %s716_s18, 1  ;;  %s716_s18 = sphi %s758_s18, %s16_s18  }
   0x2   : > { %p190_p1 = scmp.lt.s32.totalorder %s716_s18, 3 }
   0x4   : > { %p191_p2 = pnand %p661_p0, %p190_p1 }
   0x5   : > { %p223_p3 = scmp.lt.s32.totalorder (!%p191_p2), %s657_s19, 1  ;;  %s718_s24 = smov (!%p191_p2), 111  }
   0x6   : > { %194 = sbr.rel (%p191_p2) target bundleno = 656 (0x290), region = 36  ;;  %s719_s25 = smov (!%p191_p2), 112  }
   0x7   : > { %s720_s26 = smov (!%p191_p2), 127   ;;  %s721_s27 = smov (!%p191_p2), 113  }
   0x8   : > { %s722_s28 = smov (!%p191_p2), 1   ;;  %s723_s29 = smov (!%p191_p2), 16  }
   0x9   : > { %s724_s30 = smov (!%p191_p2), 15   ;;  %s726_s6 = smov (!%p191_p2), 17  }
   0xb   : > { %s878_s19 = smov (!%p223_p3, %s657_s19), 1  ;;  %v725_v2 = vmov 0.0   ;;  %v727_v3 = vmov 0   ;;  %v246_v4 = vld [vmem:[%s873_s2 + $0x8] sm:$0xff]  ;;  %v245_v5 = vld [vmem:[%s873_s2] sm:$0xff]  ;;  %v254_v6 = vlaneseq  ;;  %vm457_vm4 = vcmask 1043456  }
   0xc   : > { %s676_s20 = sshll.u32 %s878_s19, 3  ;;  %528 = vmatprep.mubr.f32.mxu0 %v725_v2  ;;  %534 = vmatprep.mubr.f32.mxu1 %v725_v2  ;;  %v787_v12 = vld [vmem:[%s874_s3] sm:$0xff]  ;;  %v792_v13 = vld [vmem:[%s874_s3 + $0x8] sm:$0xff]  ;;  %v668_v15 = vld [vmem:[%s874_s3 + $0x10] ss:$0 sm:$0xff]  ;;  %vm450_vm9 = vcmask 293888  }
   0xd   : > { %s227_s23 = scalar_lea.vmem %s871_s0, %s676_s20  ;;  %708 = vset.pattern.permute.xlu1 %v727_v3  ;;  %707 = vset.pattern.permute.xlu0 %v727_v3  ;;  %v778_v7 = vshrl.u32 %v254_v6, 7  ;;  %v780_v8 = vand.u32 127, %v254_v6  ;;  %v669_v16 = vld [vmem:[%s874_s3 + $0x18] ss:$0 sm:$0xff]  ;;  %vm554_vm10 = vcmask 7168  }
   0xe   : > { %v242_v0 = vld [vmem:[%s227_s23] sm:$0xff] }
   0xf   : > { %411 = vrot.lane.b32.xlu1 %v242_v0, %s718_s24  ;;  %340 = vst [vmem:[#allocation2 + $0x48] sm:$0xf] %v242_v0  ;;  %386 = vrot.lane.b32.xlu0 %v242_v0, %s719_s25  ;;  %v248_v1 = vcombine.high %v242_v0, %v242_v0  ;;  %v351_v11 = vsub.s32 5, %v778_v7  ;;  %vm415_vm0 = vcmp.lt.s32.totalorder %v780_v8, 111  ;;  %v395_v14 = vsub.s32 7, %v778_v7 }
  0x10   : > { %vm346_vm1 = vcmp.lt.s32.totalorder %v780_v8, 127  ;;  %vm390_vm2 = vcmp.lt.s32.totalorder %v780_v8, 112  ;;  %v376_v19 = vsub.s32 6, %v778_v7  ;;  %vm371_vm3 = vcmp.lt.s32.totalorder %v780_v8, 113 }
  0x11   : > { %341 = vst [vmem:[#allocation2 + $0x28] sm:$0xf] %v248_v1  ;;  %v352_v22 = vrot.slane %v787_v12, %v351_v11  ;;  %v356_v23 = vrot.slane %v792_v13, %v351_v11  ;;  %v396_v26 = vrot.slane %v787_v12, %v395_v14  ;;  %v400_v27 = vrot.slane %v792_v13, %v395_v14 }
  0x12   : > { %v377_v30 = vrot.slane %v787_v12, %v376_v19  ;;  %v381_v31 = vrot.slane %v792_v13, %v376_v19  ;;  %v324_v32 = vsub.s32 3, %v778_v7  ;;  %vm319_vm5 = vcmp.lt.s32.totalorder %v780_v8, 1 }
  0x13   : > { %342 = vrot.lane.b32.xlu0 %v242_v0, %s720_s26  ;;  %413 = vrot.lane.b32.xlu1 %v248_v1, %s718_s24  ;;  %v280_v49 = vsub.s32 1, %v778_v7  ;;  %vm275_vm6 = vcmp.lt.s32.totalorder %v780_v8, 16  ;;  %vm300_vm7 = vcmp.lt.s32.totalorder %v780_v8, 15  ;;  %vm256_vm8 = vcmp.lt.s32.totalorder %v780_v8, 17  ;;  %v243_v8 = vld [vmem:[%s872_s1] sm:$0xff] }
  0x14   : > { %v325_v52 = vrot.slane %v787_v12, %v324_v32  ;;  %v329_v53 = vrot.slane %v792_v13, %v324_v32 }
  0x15   : > { %v281_v60 = vrot.slane %v787_v12, %v280_v49  ;;  %v285_v63 = vrot.slane %v792_v13, %v280_v49 }
  0x17   : > { %344 = vrot.lane.b32.xlu1 %v248_v1, %s720_s26  ;;  %388 = vrot.lane.b32.xlu0 %v248_v1, %s719_s25  ;;  %s677_s25 = sshll.u32 %s878_s19, 4 }
  0x1b   : > { %369 = vrot.lane.b32.xlu1 %v248_v1, %s721_s27  ;;  %367 = vrot.lane.b32.xlu0 %v242_v0, %s721_s27 }
  0x1f   : > { %317 = vrot.lane.b32.xlu1 %v248_v1, %s722_s28  ;;  %315 = vrot.lane.b32.xlu0 %v242_v0, %s722_s28  ;;  %s232_s28 = scalar_lea.vmem %s875_s4, %s677_s25 }
  0x23   : > { %273 = vrot.lane.b32.xlu1 %v248_v1, %s723_s29  ;;  %271 = vrot.lane.b32.xlu0 %v242_v0, %s723_s29 }
  0x27   : > { %298 = vrot.lane.b32.xlu1 %v248_v1, %s724_s30  ;;  %296 = vrot.lane.b32.xlu0 %v242_v0, %s724_s30  ;;  %s237_s30 = scalar_lea.vmem %s876_s5, %s677_s25 }
  0x2b   : > { %252 = vrot.lane.b32.xlu1 %v248_v1, %s726_s6  ;;  %250 = vrot.lane.b32.xlu0 %v242_v0, %s726_s6  ;;  %v305_v0 = vsub.s32 2, %v778_v7 }
  0x2d   : > { %v306_v14 = vrot.slane %v787_v12, %v305_v0 }
  0x2f   : > { %447 = vperm.xlu1 %708, %v246_v4   ;;  %442 = vperm.xlu0 %707, %v245_v5  }
  0x81   : > { %v412_v9 = vpop.permute.xlu1 %411  ;;  %v387_v10 = vpop.permute.xlu0 %386 }
  0x85   : > { %v343_v17 = vpop.permute.xlu0 %342  ;;  %v414_v18 = vpop.permute.xlu1 %413 }
  0x86   : > { %v416_v20 = vsel %vm415_vm0, %v412_v9, %v414_v18  ;;  %v417_v21 = vsel %vm415_vm0, %v414_v18, %v412_v9  ;;  %v261_v9 = vsub.s32 0, %v778_v7 }
  0x87   : > { %v426_v24 = vmul.f32 %v668_v15, %v416_v20  ;;  %v427_v25 = vmul.f32 %v669_v16, %v417_v21  ;;  %v310_v15 = vrot.slane %v792_v13, %v305_v0 }
  0x89   : > { %428 = vst [vmem:[#allocation2 + $0x40] sm:$0xf] %v426_v24  ;;  %429 = vst [vmem:[#allocation2 + $0x38] sm:$0xf] %v427_v25  ;;  %v345_v28 = vpop.permute.xlu1 %344  ;;  %v389_v29 = vpop.permute.xlu0 %388  ;;  %v262_v24 = vrot.slane %v787_v12, %v261_v9 }
  0x8a   : > { %v347_v33 = vsel %vm346_vm1, %v343_v17, %v345_v28  ;;  %v348_v34 = vsel %vm346_vm1, %v345_v28, %v343_v17  ;;  %v391_v35 = vsel %vm390_vm2, %v387_v10, %v389_v29  ;;  %v392_v36 = vsel %vm390_vm2, %v389_v29, %v387_v10 }
  0x8b   : > { %v357_v37 = vmul.f32 %v352_v22, %v347_v33  ;;  %v358_v38 = vmul.f32 %v356_v23, %v348_v34  ;;  %v401_v39 = vmul.f32 %v396_v26, %v391_v35  ;;  %v402_v40 = vmul.f32 %v400_v27, %v392_v36 }
  0x8c   : > { %v266_v28 = vrot.slane %v792_v13, %v261_v9 }
  0x8d   : > { %v361_v41 = vrot.slane %v357_v37, 4  ;;  %v362_v42 = vrot.slane %v358_v38, 4  ;;  %v405_v43 = vrot.slane %v401_v39, 4  ;;  %v406_v44 = vrot.slane %v402_v40, 4  ;;  %v370_v45 = vpop.permute.xlu1 %369  ;;  %v368_v46 = vpop.permute.xlu0 %367  ;;  %v244_v37 = vld [vmem:[%s872_s1 + $0x8] sm:$0xff] }
  0x8e   : > { %v372_v47 = vsel %vm371_vm3, %v368_v46, %v370_v45  ;;  %v373_v48 = vsel %vm371_vm3, %v370_v45, %v368_v46 }
  0x8f   : > { %365 = vst [vmem:[#allocation2 + $0x48] sm:$0xf0] %v361_v41  ;;  %366 = vst [vmem:[#allocation2 + $0x28] sm:$0xf0] %v362_v42  ;;  %v382_v50 = vmul.f32 %v377_v30, %v372_v47  ;;  %v383_v51 = vmul.f32 %v381_v31, %v373_v48 }
  0x90   : > { %409 = vst [vmem:[#allocation2 + $0x8] sm:$0xf0] %v405_v43  ;;  %410 = vst [vmem:[#allocation2 + $0x20] sm:$0xf0] %v406_v44  ;;  %v439_v54 = vld [vmem:[#allocation2 + $0x38] sm:$0xf] }
  0x91   : > { %v438_v55 = vld [vmem:[#allocation2 + $0x40] sm:$0xf]  ;;  %384 = vst [vmem:[#allocation2 + $0x8] sm:$0xf] %v382_v50  ;;  %385 = vst [vmem:[#allocation2 + $0x20] sm:$0xf] %v383_v51  ;;  %670 = vmatprep.subr.msk.mxu0 %vm457_vm4, %v439_v54  ;;  %679 = vmatprep.subr.msk.mxu1 %vm457_vm4, %v439_v54  ;;  %v318_v56 = vpop.permute.xlu1 %317  ;;  %v316_v57 = vpop.permute.xlu0 %315 }
  0x92   : > { %v320_v58 = vsel %vm319_vm5, %v316_v57, %v318_v56  ;;  %v321_v59 = vsel %vm319_vm5, %v318_v56, %v316_v57  ;;  %671 = vmatpush1.msk.msra.mxu0 %vm457_vm4, %v438_v55  ;;  %684 = vmatpush1.msk.msra.mxu1 %vm457_vm4, %v438_v55 }
  0x93   : > { %v330_v61 = vmul.f32 %v325_v52, %v321_v59  ;;  %v331_v62 = vmul.f32 %v329_v53, %v320_v58 }
  0x95   : > { %v334_v1 = vrot.slane %v330_v61, 4  ;;  %v335_v2 = vrot.slane %v331_v62, 4  ;;  %v274_v3 = vpop.permute.xlu1 %273  ;;  %v272_v4 = vpop.permute.xlu0 %271 }
  0x96   : > { %v276_v5 = vsel %vm275_vm6, %v272_v4, %v274_v3  ;;  %v277_v6 = vsel %vm275_vm6, %v274_v3, %v272_v4  ;;  %v435_v23 = vld [vmem:[#allocation2 + $0x28] sm:$0xff] }
  0x97   : > { %338 = vst [vmem:[#allocation2 + $0x18] sm:$0xf0] %v334_v1  ;;  %339 = vst [vmem:[#allocation2 + $0x10] sm:$0xf0] %v335_v2  ;;  %v286_v10 = vmul.f32 %v281_v60, %v277_v6  ;;  %v287_v11 = vmul.f32 %v285_v63, %v276_v5  ;;  %v434_v27 = vld [vmem:[#allocation2 + $0x48] sm:$0xff] }
  0x98   : > { %v437_v16 = vld [vmem:[#allocation2 + $0x20] sm:$0xff]  ;;  %v436_v17 = vld [vmem:[#allocation2 + $0x8] sm:$0xff] }
  0x99   : > { %v290_v18 = vrot.slane %v286_v10, 4  ;;  %v291_v19 = vrot.slane %v287_v11, 4  ;;  %v299_v20 = vpop.permute.xlu1 %298  ;;  %488 = vmatprep.subr.mxu0 %v437_v16  ;;  %680 = vmatprep.subr.mxu1 %v437_v16  ;;  %v297_v21 = vpop.permute.xlu0 %296 }
  0x9a   : > { %v301_v22 = vsel %vm300_vm7, %v297_v21, %v299_v20  ;;  %v302_v7 = vsel %vm300_vm7, %v299_v20, %v297_v21  ;;  %489 = vmatpush1.msra.mxu0 %v436_v17  ;;  %685 = vmatpush1.msra.mxu1 %v436_v17 }
  0x9b   : > { %294 = vst [vmem:[#allocation2 + $0x30] sm:$0xf0] %v290_v18  ;;  %295 = vst [vmem:[#allocation2] sm:$0xf0] %v291_v19  ;;  %v311_v25 = vmul.f32 %v306_v14, %v302_v7  ;;  %v312_v26 = vmul.f32 %v310_v15, %v301_v22  ;;  %490 = vmatprep.subr.mxu0 %v435_v23  ;;  %681 = vmatprep.subr.mxu1 %v435_v23 }
  0x9c   : > { %491 = vmatpush1.msra.mxu0 %v434_v27  ;;  %686 = vmatpush1.msra.mxu1 %v434_v27 }
  0x9d   : > { %313 = vst [vmem:[#allocation2 + $0x18] sm:$0xf] %v311_v25  ;;  %314 = vst [vmem:[#allocation2 + $0x10] sm:$0xf] %v312_v26  ;;  %v253_v29 = vpop.permute.xlu1 %252  ;;  %v251_v30 = vpop.permute.xlu0 %250 }
  0x9e   : > { %v257_v31 = vsel %vm256_vm8, %v251_v30, %v253_v29  ;;  %v258_v32 = vsel %vm256_vm8, %v253_v29, %v251_v30 }
  0x9f   : > { %v267_v12 = vmul.f32 %v262_v24, %v258_v32  ;;  %v268_v33 = vmul.f32 %v266_v28, %v257_v31 }
  0xa1   : > { %269 = vst [vmem:[#allocation2 + $0x30] sm:$0xf] %v267_v12  ;;  %270 = vst [vmem:[#allocation2] sm:$0xf] %v268_v33 }
  0xa4   : > { %v433_v34 = vld [vmem:[#allocation2 + $0x10] sm:$0xff]  ;;  %v432_v35 = vld [vmem:[#allocation2 + $0x18] sm:$0xff] }
  0xa5   : > { %492 = vmatprep.subr.mxu0 %v433_v34  ;;  %682 = vmatprep.subr.mxu1 %v433_v34 }
  0xa6   : > { %493 = vmatpush1.msra.mxu0 %v432_v35  ;;  %687 = vmatpush1.msra.mxu1 %v432_v35 }
  0xa8   : > { %v431_v13 = vld [vmem:[#allocation2] sm:$0xff]  ;;  %v430_v36 = vld [vmem:[#allocation2 + $0x30] sm:$0xff] }
  0xa9   : > { %494 = vmatprep.subr.mxu0 %v431_v13  ;;  %683 = vmatprep.subr.mxu1 %v431_v13 }
  0xaa   : > { %495 = vmatpush1.msra.mxu0 %v430_v36  ;;  %688 = vmatpush1.msra.mxu1 %v430_v36  ;;  %v448_v38 = vpop.permute.xlu1 %447  ;;  %v443_v39 = vpop.permute.xlu0 %442 }
  0xab   : > { %672 = vmatmul.mubr.msk.f32.vlgmr.msra.gmra.mxu0 %vm450_vm9, %v243_v8  ;;  %673 = vmatmul.mubr.msk.f32.vlgmr.msra.gmra.mxu1 %vm450_vm9, %v244_v37 }
 0x16b   : > { %v530_v40 = vpop.f32.mrf.mxu0  ;;  %v536_v41 = vpop.f32.mrf.mxu1 }
 0x16c   : > { %v531_v44 = vadd.f32 %v530_v40, %v443_v39  ;;  %v537_v45 = vadd.f32 %v536_v41, %v448_v38 }
 0x16d   : > { %v532_v42 = vpop.f32.mrf.mxu0  ;;  %v538_v43 = vpop.f32.mrf.mxu1 }
 0x16e   : > { %v533_v46 = vadd.f32 %v532_v42, %v443_v39  ;;  %v539_v47 = vadd.f32 %v538_v43, %v448_v38 }
 0x170   : > { %v544_v48 = vadd.f32 %v539_v47, %v537_v45  ;;  %v541_v49 = vadd.f32 %v533_v46, %v531_v44 }
 0x172   : > { %545 = vadd.xlane.f32.xlu0 %v544_v48  ;;  %542 = vadd.xlane.f32.xlu1 %v541_v49 }
 0x1fb   : > { %v546_v50 = vpop.xlane.xlu0 %545  ;;  %v543_v51 = vpop.xlane.xlu1 %542 }
 0x1fc   : > { %v549_v52 = vmul.f32 0.00390625, %v546_v50  ;;  %v548_v53 = vmul.f32 0.00390625, %v543_v51 }
 0x1fe   : > { %556 = vst.msk [vmem:[%s232_s28 + $0x8] sm:$0xff] %vm554_vm10, %v549_v52  ;;  %555 = vst.msk [vmem:[%s232_s28] sm:$0xff] %vm554_vm10, %v548_v53  ;;  %v552_v54 = vsub.f32 %v537_v45, %v549_v52  ;;  %v553_v55 = vsub.f32 %v539_v47, %v549_v52  ;;  %v550_v56 = vsub.f32 %v531_v44, %v548_v53 }
 0x1ff   : > { %v551_v57 = vsub.f32 %v533_v46, %v548_v53 }
 0x200   : > { %v559_v58 = vmul.f32 %v552_v54, %v552_v54  ;;  %v560_v59 = vmul.f32 %v553_v55, %v553_v55  ;;  %v557_v60 = vmul.f32 %v550_v56, %v550_v56 }
 0x201   : > { %v558_v61 = vmul.f32 %v551_v57, %v551_v57 }
 0x202   : > { %v564_v62 = vadd.f32 %v560_v59, %v559_v58 }
 0x203   : > { %v561_v63 = vadd.f32 %v558_v61, %v557_v60 }
 0x204   : > { %565 = vadd.xlane.f32.xlu1 %v564_v62 }
 0x205   : > { %562 = vadd.xlane.f32.xlu0 %v561_v63 }
 0x28d   : > { %v566_v1 = vpop.xlane.xlu1 %565 }
 0x28e   : > { %v563_v0 = vpop.xlane.xlu0 %562  ;;  %568 = vst.msk [vmem:[%s237_s30 + $0x8] sm:$0xff] %vm554_vm10, %v566_v1 }
 0x28f   : > { %567 = vst.msk [vmem:[%s237_s30] sm:$0xff] %vm554_vm10, %v563_v0 }
 0x290 PF: > { %s16_s18 = sadd.s32 1, %s716_s18  }
 0x291   : > { %p13_p4 = scmp.ge.s32.totalorder %s16_s18, 4  }
 0x293   :  { %15 = sbr.rel (!%p13_p4) target bundleno = 1 (0x1), region = 78 }

// kernel: double_conv_block.3
= control target key start
LH: loop header
LB: loop body
LE: loop exit
PB: predicated region body
PF: predicated region fallthrough
CT: control target
= control target key end

     0   :  { %s1253_s13 = smov 0   ;;  %s1655_s0 = inlined_call_operand.vmem [shape: f32[2,4,256], index: 0, kind: input, shape index: {}]   ;;  %s1656_s1 = inlined_call_operand.vmem [shape: f32[16,36], index: 1, kind: input, shape index: {}]   ;;  %s1657_s2 = inlined_call_operand.vmem [shape: f32[16,1], index: 2, kind: input, shape index: {}]   ;;  %s1658_s3 = inlined_call_operand.vmem [shape: f32[16,1], index: 3, kind: input, shape index: {}]   ;;  %s1659_s4 = inlined_call_operand.vmem [shape: f32[16,1], index: 4, kind: input, shape index: {}]   ;;  %s1660_s5 = inlined_call_operand.vmem [shape: f32[8,144], index: 5, kind: input, shape index: {}]   ;;  %s1661_s6 = inlined_call_operand.vmem [shape: f32[8,1], index: 6, kind: input, shape index: {}]   ;;  %s1662_s7 = inlined_call_operand.vmem [shape: f32[9,256], index: 7, kind: input, shape index: {}]   ;;  %s1663_s8 = inlined_call_operand.vmem [shape: f32[2,8,256], index: 8, kind: output, shape index: {0}]   ;;  %s1664_s9 = inlined_call_operand.vmem [shape: f32[2,8,1], index: 9, kind: output, shape index: {1}]   ;;  %s1665_s10 = inlined_call_operand.vmem [shape: f32[2,8,1], index: 10, kind: output, shape index: {2}]  }
   0x1 LB: > { %s1137_s14 = sadd.s32 4294967295, %s1186_s13   ;;  %p1141_p0 = scmp.ge.s32.totalorder %s1186_s13, 1  ;;  %s1186_s13 = sphi %s1253_s13, %s21_s13  }
   0x2   : > { %p317_p1 = scmp.lt.s32.totalorder %s1186_s13, 3 }
   0x4   : > { %p318_p2 = pnand %p1141_p0, %p317_p1 }
   0x5   : > { %p363_p3 = scmp.lt.s32.totalorder (!%p318_p2), %s1137_s14, 1  ;;  %s1188_s19 = smov (!%p318_p2), 111  }
   0x6   : > { %321 = sbr.rel (%p318_p2) target bundleno = 1038 (0x40e), region = 52  ;;  %s1189_s20 = smov (!%p318_p2), 112  }
   0x7   : > { %s1190_s21 = smov (!%p318_p2), 127   ;;  %s1191_s22 = smov (!%p318_p2), 113  }
   0x8   : > { %s1192_s23 = smov (!%p318_p2), 1   ;;  %s1193_s24 = smov (!%p318_p2), 16  }
   0x9   : > { %s1194_s25 = smov (!%p318_p2), 15   ;;  %s1196_s26 = smov (!%p318_p2), 17  }
   0xb   : > { %s1667_s14 = smov (!%p363_p3, %s1137_s14), 1  ;;  %v1195_v2 = vmov 0.0   ;;  %v389_v3 = vld [vmem:[%s1657_s2 + $0x8] sm:$0xff]  ;;  %v388_v4 = vld [vmem:[%s1657_s2] sm:$0xff]  ;;  %v1197_v5 = vmov 0   ;;  %v397_v10 = vlaneseq  ;;  %vm600_vm4 = vcmask 1043456  }
   0xc   : > { %s1264_s15 = sshll.u32 %s1667_s14, 3  ;;  %671 = vmatprep.mubr.f32.mxu0 %v1195_v2  ;;  %1177 = vset.pattern.permute.xlu0 %v1197_v5  ;;  %v684_v6 = vld [vmem:[%s1658_s3] sm:$0xff]  ;;  %v685_v7 = vld [vmem:[%s1658_s3 + $0x8] sm:$0xff]  ;;  %v1325_v19 = vld [vmem:[%s1662_s7 + $0x10] ss:$0 sm:$0xff]  ;;  %vm593_vm9 = vcmask 293888  }
   0xd   : > { %s367_s18 = scalar_lea.vmem %s1655_s0, %s1264_s15  ;;  %1178 = vset.pattern.permute.xlu1 %v1197_v5  ;;  %v700_v8 = vld [vmem:[%s1659_s4] sm:$0xff]  ;;  %v701_v9 = vld [vmem:[%s1659_s4 + $0x8] sm:$0xff]  ;;  %v1305_v11 = vshrl.u32 %v397_v10, 7  ;;  %v1307_v12 = vand.u32 127, %v397_v10  ;;  %v1330_v20 = vld [vmem:[%s1662_s7 + $0x18] ss:$0 sm:$0xff]  ;;  %s376_s28 = scalar_lea.vmem %s1664_s9, %s1264_s15 }
   0xe   : > { %v385_v0 = vld [vmem:[%s367_s18] sm:$0xff]  ;;  %v1319_v17 = vld [vmem:[%s1662_s7 + $0x8] sm:$0xff]  ;;  %vm928_vm10 = vcmask 130048   ;;  %vm1012_vm11 = vcmask 7168   ;;  %s380_s30 = scalar_lea.vmem %s1665_s10, %s1264_s15 }
   0xf   : > { %554 = vrot.lane.b32.xlu1 %v385_v0, %s1188_s19  ;;  %483 = vst [vmem:[#allocation2 + $0x48] sm:$0xf] %v385_v0  ;;  %529 = vrot.lane.b32.xlu0 %v385_v0, %s1189_s20  ;;  %v391_v1 = vcombine.high %v385_v0, %v385_v0  ;;  %v494_v15 = vsub.s32 5, %v1305_v11  ;;  %vm558_vm0 = vcmp.lt.s32.totalorder %v1307_v12, 111  ;;  %v1314_v16 = vld [vmem:[%s1662_s7] sm:$0xff]  ;;  %v538_v18 = vsub.s32 7, %v1305_v11 }
  0x10   : > { %vm489_vm1 = vcmp.lt.s32.totalorder %v1307_v12, 127  ;;  %vm533_vm2 = vcmp.lt.s32.totalorder %v1307_v12, 112  ;;  %v519_v23 = vsub.s32 6, %v1305_v11  ;;  %vm514_vm3 = vcmp.lt.s32.totalorder %v1307_v12, 113 }
  0x11   : > { %484 = vst [vmem:[#allocation2 + $0x28] sm:$0xf] %v391_v1  ;;  %v1340_v26 = vrot.slane %v1314_v16, %v494_v15  ;;  %v1343_v27 = vrot.slane %v1319_v17, %v494_v15  ;;  %v1348_v30 = vrot.slane %v1314_v16, %v538_v18  ;;  %v1351_v31 = vrot.slane %v1319_v17, %v538_v18 }
  0x12   : > { %v1355_v34 = vrot.slane %v1314_v16, %v519_v23  ;;  %v1358_v35 = vrot.slane %v1319_v17, %v519_v23  ;;  %v467_v36 = vsub.s32 3, %v1305_v11  ;;  %vm462_vm5 = vcmp.lt.s32.totalorder %v1307_v12, 1 }
  0x13   : > { %485 = vrot.lane.b32.xlu0 %v385_v0, %s1190_s21  ;;  %556 = vrot.lane.b32.xlu1 %v391_v1, %s1188_s19  ;;  %v423_v57 = vsub.s32 1, %v1305_v11  ;;  %vm418_vm6 = vcmp.lt.s32.totalorder %v1307_v12, 16  ;;  %vm443_vm7 = vcmp.lt.s32.totalorder %v1307_v12, 15  ;;  %vm399_vm8 = vcmp.lt.s32.totalorder %v1307_v12, 17 }
  0x14   : > { %v1379_v53 = vrot.slane %v1314_v16, %v467_v36  ;;  %v1384_v56 = vrot.slane %v1319_v17, %v467_v36 }
  0x15   : > { %v1401_v5 = vrot.slane %v1319_v17, %v423_v57 }
  0x17   : > { %487 = vrot.lane.b32.xlu1 %v391_v1, %s1190_s21  ;;  %531 = vrot.lane.b32.xlu0 %v391_v1, %s1189_s20 }
  0x1b   : > { %512 = vrot.lane.b32.xlu1 %v391_v1, %s1191_s22  ;;  %510 = vrot.lane.b32.xlu0 %v385_v0, %s1191_s22 }
  0x1f   : > { %460 = vrot.lane.b32.xlu1 %v391_v1, %s1192_s23  ;;  %458 = vrot.lane.b32.xlu0 %v385_v0, %s1192_s23 }
  0x23   : > { %416 = vrot.lane.b32.xlu1 %v391_v1, %s1193_s24  ;;  %414 = vrot.lane.b32.xlu0 %v385_v0, %s1193_s24 }
  0x27   : > { %441 = vrot.lane.b32.xlu1 %v391_v1, %s1194_s25  ;;  %439 = vrot.lane.b32.xlu0 %v385_v0, %s1194_s25 }
  0x2b   : > { %395 = vrot.lane.b32.xlu1 %v391_v1, %s1196_s26  ;;  %393 = vrot.lane.b32.xlu0 %v385_v0, %s1196_s26  ;;  %v448_v0 = vsub.s32 2, %v1305_v11 }
  0x2f   : > { %590 = vperm.xlu0 %1177, %v389_v3   ;;  %585 = vperm.xlu1 %1178, %v388_v4   ;;  %v1398_v4 = vrot.slane %v1314_v16, %v423_v57 }
  0x33   : > { %688 = vperm.xlu0 %1177, %v684_v6   ;;  %693 = vperm.xlu1 %1178, %v685_v7  }
  0x37   : > { %704 = vperm.xlu0 %1177, %v700_v8   ;;  %709 = vperm.xlu1 %1178, %v701_v9  }
  0x81   : > { %v555_v13 = vpop.permute.xlu1 %554  ;;  %v530_v14 = vpop.permute.xlu0 %529 }
  0x85   : > { %v486_v21 = vpop.permute.xlu0 %485  ;;  %v557_v22 = vpop.permute.xlu1 %556 }
  0x86   : > { %v559_v24 = vsel %vm558_vm0, %v555_v13, %v557_v22  ;;  %v560_v25 = vsel %vm558_vm0, %v557_v22, %v555_v13  ;;  %v404_v22 = vsub.s32 0, %v1305_v11 }
  0x87   : > { %v569_v28 = vmul.f32 %v1325_v19, %v559_v24  ;;  %v570_v29 = vmul.f32 %v1330_v20, %v560_v25 }
  0x89   : > { %571 = vst [vmem:[#allocation2 + $0x40] sm:$0xf] %v569_v28  ;;  %572 = vst [vmem:[#allocation2 + $0x38] sm:$0xf] %v570_v29  ;;  %v488_v32 = vpop.permute.xlu1 %487  ;;  %v532_v33 = vpop.permute.xlu0 %531 }
  0x8a   : > { %v490_v37 = vsel %vm489_vm1, %v486_v21, %v488_v32  ;;  %v491_v38 = vsel %vm489_vm1, %v488_v32, %v486_v21  ;;  %v534_v39 = vsel %vm533_vm2, %v530_v14, %v532_v33  ;;  %v535_v40 = vsel %vm533_vm2, %v532_v33, %v530_v14 }
  0x8b   : > { %v500_v41 = vmul.f32 %v1340_v26, %v490_v37  ;;  %v501_v42 = vmul.f32 %v1343_v27, %v491_v38  ;;  %v544_v43 = vmul.f32 %v1348_v30, %v534_v39  ;;  %v545_v44 = vmul.f32 %v1351_v31, %v535_v40 }
  0x8c   : > { %v1409_v14 = vrot.slane %v1314_v16, %v448_v0  ;;  %v1414_v21 = vrot.slane %v1319_v17, %v448_v0  ;;  %v1425_v40 = vrot.slane %v1314_v16, %v404_v22 }
  0x8d   : > { %v504_v45 = vrot.slane %v500_v41, 4  ;;  %v505_v46 = vrot.slane %v501_v42, 4  ;;  %v548_v47 = vrot.slane %v544_v43, 4  ;;  %v549_v48 = vrot.slane %v545_v44, 4  ;;  %v513_v49 = vpop.permute.xlu1 %512  ;;  %v511_v50 = vpop.permute.xlu0 %510 }
  0x8e   : > { %v515_v51 = vsel %vm514_vm3, %v511_v50, %v513_v49  ;;  %v516_v52 = vsel %vm514_vm3, %v513_v49, %v511_v50  ;;  %v1428_v41 = vrot.slane %v1319_v17, %v404_v22  ;;  %v386_v50 = vld [vmem:[%s1656_s1] sm:$0xff] }
  0x8f   : > { %508 = vst [vmem:[#allocation2 + $0x48] sm:$0xf0] %v504_v45  ;;  %509 = vst [vmem:[#allocation2 + $0x28] sm:$0xf0] %v505_v46  ;;  %v525_v54 = vmul.f32 %v1355_v34, %v515_v51  ;;  %v526_v55 = vmul.f32 %v1358_v35, %v516_v52  ;;  %v387_v51 = vld [vmem:[%s1656_s1 + $0x8] sm:$0xff] }
  0x90   : > { %552 = vst [vmem:[#allocation2 + $0x8] sm:$0xf0] %v548_v47  ;;  %553 = vst [vmem:[#allocation2 + $0x20] sm:$0xf0] %v549_v48  ;;  %v582_v58 = vld [vmem:[#allocation2 + $0x38] sm:$0xf] }
  0x91   : > { %v581_v59 = vld [vmem:[#allocation2 + $0x40] sm:$0xf]  ;;  %527 = vst [vmem:[#allocation2 + $0x8] sm:$0xf] %v525_v54  ;;  %528 = vst [vmem:[#allocation2 + $0x20] sm:$0xf] %v526_v55  ;;  %1150 = vmatprep.subr.msk.mxu0 %vm600_vm4, %v582_v58  ;;  %v461_v60 = vpop.permute.xlu1 %460  ;;  %v459_v61 = vpop.permute.xlu0 %458 }
  0x92   : > { %v463_v62 = vsel %vm462_vm5, %v459_v61, %v461_v60  ;;  %v464_v63 = vsel %vm462_vm5, %v461_v60, %v459_v61  ;;  %1151 = vmatpush1.msk.msra.mxu0 %vm600_vm4, %v581_v59 }
  0x93   : > { %v473_v1 = vmul.f32 %v1379_v53, %v464_v63  ;;  %v474_v3 = vmul.f32 %v1384_v56, %v463_v62 }
  0x95   : > { %v477_v6 = vrot.slane %v473_v1, 4  ;;  %v478_v7 = vrot.slane %v474_v3, 4  ;;  %v417_v8 = vpop.permute.xlu1 %416  ;;  %v415_v9 = vpop.permute.xlu0 %414 }
  0x96   : > { %v419_v10 = vsel %vm418_vm6, %v415_v9, %v417_v8  ;;  %v420_v13 = vsel %vm418_vm6, %v417_v8, %v415_v9  ;;  %v578_v37 = vld [vmem:[#allocation2 + $0x28] sm:$0xff] }
  0x97   : > { %481 = vst [vmem:[#allocation2 + $0x18] sm:$0xf0] %v477_v6  ;;  %482 = vst [vmem:[#allocation2 + $0x10] sm:$0xf0] %v478_v7  ;;  %v429_v15 = vmul.f32 %v1398_v4, %v420_v13  ;;  %v430_v18 = vmul.f32 %v1401_v5, %v419_v10  ;;  %v577_v39 = vld [vmem:[#allocation2 + $0x48] sm:$0xff] }
  0x98   : > { %v580_v23 = vld [vmem:[#allocation2 + $0x20] sm:$0xff]  ;;  %v579_v24 = vld [vmem:[#allocation2 + $0x8] sm:$0xff] }
  0x99   : > { %v433_v25 = vrot.slane %v429_v15, 4  ;;  %v434_v28 = vrot.slane %v430_v18, 4  ;;  %v442_v29 = vpop.permute.xlu1 %441  ;;  %631 = vmatprep.subr.mxu0 %v580_v23  ;;  %v440_v32 = vpop.permute.xlu0 %439 }
  0x9a   : > { %v444_v33 = vsel %vm443_vm7, %v440_v32, %v442_v29  ;;  %v445_v36 = vsel %vm443_vm7, %v442_v29, %v440_v32  ;;  %632 = vmatpush1.msra.mxu0 %v579_v24  ;;  %v722_v29 = vld [vmem:[%s1661_s6] sm:$0xff] }
  0x9b   : > { %437 = vst [vmem:[#allocation2 + $0x30] sm:$0xf0] %v433_v25  ;;  %438 = vst [vmem:[#allocation2] sm:$0xf0] %v434_v28  ;;  %v454_v11 = vmul.f32 %v1409_v14, %v445_v36  ;;  %v455_v38 = vmul.f32 %v1414_v21, %v444_v33  ;;  %633 = vmatprep.subr.mxu0 %v578_v37  ;;  %v721_v28 = vld [vmem:[%s1660_s5 + $0x8] sm:$0xff] }
  0x9c   : > { %634 = vmatpush1.msra.mxu0 %v577_v39  ;;  %1154 = vmatprep.mubr.msk.f32.mxu1 %vm928_vm10, %v721_v28 }
  0x9d   : > { %456 = vst [vmem:[#allocation2 + $0x18] sm:$0xf] %v454_v11  ;;  %457 = vst [vmem:[#allocation2 + $0x10] sm:$0xf] %v455_v38  ;;  %v396_v42 = vpop.permute.xlu1 %395  ;;  %v394_v43 = vpop.permute.xlu0 %393 }
  0x9e   : > { %v400_v44 = vsel %vm399_vm8, %v394_v43, %v396_v42  ;;  %v401_v45 = vsel %vm399_vm8, %v396_v42, %v394_v43 }
  0x9f   : > { %v410_v46 = vmul.f32 %v1425_v40, %v401_v45  ;;  %v411_v47 = vmul.f32 %v1428_v41, %v400_v44 }
  0xa1   : > { %412 = vst [vmem:[#allocation2 + $0x30] sm:$0xf] %v410_v46  ;;  %413 = vst [vmem:[#allocation2] sm:$0xf] %v411_v47 }
  0xa4   : > { %v576_v16 = vld [vmem:[#allocation2 + $0x10] sm:$0xff]  ;;  %v575_v17 = vld [vmem:[#allocation2 + $0x18] sm:$0xff] }
  0xa5   : > { %635 = vmatprep.subr.mxu0 %v576_v16 }
  0xa6   : > { %636 = vmatpush1.msra.mxu0 %v575_v17 }
  0xa8   : > { %v574_v48 = vld [vmem:[#allocation2] sm:$0xff]  ;;  %v573_v49 = vld [vmem:[#allocation2 + $0x30] sm:$0xff] }
  0xa9   : > { %637 = vmatprep.subr.mxu0 %v574_v48 }
  0xaa   : > { %638 = vmatpush1.msra.mxu0 %v573_v49  ;;  %v591_v52 = vpop.permute.xlu0 %590  ;;  %v586_v55 = vpop.permute.xlu1 %585 }
  0xab   : > { %1152 = vmatmul.mubr.msk.f32.vlgmr.msra.gmra.mxu0 %vm593_vm9, %v386_v50 }
  0xac   : > { %677 = vmatprep.mubr.f32.mxu0 %v1195_v2 }
  0xae   : > { %v689_v54 = vpop.permute.xlu0 %688  ;;  %v694_v9 = vpop.permute.xlu1 %693 }
  0xaf   : > { %1153 = vmatmul.mubr.msk.f32.gmra.mxu0 %vm593_vm9, %v387_v51 }
  0xb2   : > { %v705_v62 = vpop.permute.xlu0 %704  ;;  %v710_v18 = vpop.permute.xlu1 %709 }
 0x16b   : > { %v673_v57 = vpop.f32.mrf.mxu0 }
 0x16c   : > { %v674_v58 = vadd.f32 %v673_v57, %v586_v55 }
 0x16d   : > { %v675_v59 = vpop.f32.mrf.mxu0 }
 0x16e   : > { %v696_v60 = vmul.f32 %v689_v54, %v674_v58  ;;  %v676_v61 = vadd.f32 %v675_v59, %v586_v55 }
 0x16f   : > { %v679_v6 = vpop.f32.mrf.mxu0 }
 0x170   : > { %v712_v63 = vadd.f32 %v705_v62, %v696_v60  ;;  %v697_v0 = vmul.f32 %v689_v54, %v676_v61  ;;  %v680_v8 = vadd.f32 %v679_v6, %v591_v52 }
 0x171   : > { %v681_v7 = vpop.f32.mrf.mxu0 }
 0x172   : > { %v1443_v1 = vmax.f32 %v712_v63, 0.0  ;;  %v713_v3 = vadd.f32 %v705_v62, %v697_v0  ;;  %v682_v10 = vadd.f32 %v681_v7, %v591_v52  ;;  %v698_v13 = vmul.f32 %v694_v9, %v680_v8 }
 0x174   : > { %v1445_v2 = vmax.f32 %v713_v3, 0.0  ;;  %847 = vrot.lane.b32.xlu1 %v1443_v1, %s1189_s20  ;;  %v699_v15 = vmul.f32 %v694_v9, %v682_v10  ;;  %v714_v22 = vadd.f32 %v710_v18, %v698_v13 }
 0x176   : > { %851 = vrot.lane.b32.xlu0 %v1445_v2, %s1189_s20  ;;  %v715_v23 = vadd.f32 %v710_v18, %v699_v15  ;;  %v1469_v24 = vmax.f32 %v714_v22, 0.0 }
 0x178   : > { %827 = vrot.lane.b32.xlu1 %v1443_v1, %s1191_s22  ;;  %v1473_v25 = vmax.f32 %v715_v23, 0.0 }
 0x17a   : > { %831 = vrot.lane.b32.xlu0 %v1445_v2, %s1191_s22 }
 0x17c   : > { %807 = vrot.lane.b32.xlu1 %v1443_v1, %s1190_s21 }
 0x17e   : > { %811 = vrot.lane.b32.xlu0 %v1445_v2, %s1190_s21 }
 0x180   : > { %783 = vrot.lane.b32.xlu1 %v1443_v1, %s1192_s23 }
 0x182   : > { %787 = vrot.lane.b32.xlu0 %v1445_v2, %s1192_s23 }
 0x184   : > { %763 = vrot.lane.b32.xlu1 %v1443_v1, %s1194_s25 }
 0x186   : > { %767 = vrot.lane.b32.xlu0 %v1445_v2, %s1194_s25 }
 0x188   : > { %743 = vrot.lane.b32.xlu1 %v1443_v1, %s1193_s24 }
 0x18a   : > { %747 = vrot.lane.b32.xlu0 %v1445_v2, %s1193_s24 }
 0x18c   : > { %849 = vrot.lane.b32.xlu1 %v1469_v24, %s1189_s20 }
 0x18e   : > { %853 = vrot.lane.b32.xlu0 %v1473_v25, %s1189_s20 }
 0x190   : > { %829 = vrot.lane.b32.xlu1 %v1469_v24, %s1191_s22 }
 0x192   : > { %833 = vrot.lane.b32.xlu0 %v1473_v25, %s1191_s22 }
 0x194   : > { %809 = vrot.lane.b32.xlu1 %v1469_v24, %s1190_s21 }
 0x196   : > { %813 = vrot.lane.b32.xlu0 %v1473_v25, %s1190_s21 }
 0x198   : > { %723 = vrot.lane.b32.xlu1 %v1443_v1, %s1196_s26 }
 0x19a   : > { %727 = vrot.lane.b32.xlu0 %v1445_v2, %s1196_s26 }
 0x19c   : > { %785 = vrot.lane.b32.xlu1 %v1469_v24, %s1192_s23 }
 0x19e   : > { %789 = vrot.lane.b32.xlu0 %v1473_v25, %s1192_s23 }
 0x1a0   : > { %765 = vrot.lane.b32.xlu1 %v1469_v24, %s1194_s25 }
 0x1a2   : > { %769 = vrot.lane.b32.xlu0 %v1473_v25, %s1194_s25  ;;  %s1158_s25 = sshll.u32 %s1667_s14, 4 }
 0x1a3   : > { %s372_s17 = scalar_lea.vmem %s1663_s8, %s1158_s25 }
 0x1a4   : > { %745 = vrot.lane.b32.xlu1 %v1469_v24, %s1193_s24 }
 0x1a6   : > { %749 = vrot.lane.b32.xlu0 %v1473_v25, %s1193_s24 }
 0x1a8   : > { %725 = vrot.lane.b32.xlu1 %v1469_v24, %s1196_s26 }
 0x1aa   : > { %729 = vrot.lane.b32.xlu0 %v1473_v25, %s1196_s26 }
 0x1ac   : > { %869 = vrot.lane.b32.xlu1 %v1469_v24, %s1188_s19 }
 0x1ae   : > { %873 = vrot.lane.b32.xlu0 %v1473_v25, %s1188_s19 }
 0x1b0   : > { %867 = vrot.lane.b32.xlu1 %v1443_v1, %s1188_s19 }
 0x1b2   : > { %871 = vrot.lane.b32.xlu0 %v1445_v2, %s1188_s19 }
 0x1b4   : > { %925 = vperm.xlu1 %1178, %v722_v29  }
 0x1e6   : > { %v848_v32 = vpop.permute.xlu1 %847 }
 0x1e8   : > { %v852_v33 = vpop.permute.xlu0 %851 }
 0x1e9   : > { %v857_v17 = vsel %vm533_vm2, %v852_v33, %v848_v32  ;;  %v855_v50 = vsel %vm533_vm2, %v848_v32, %v852_v33 }
 0x1ea   : > { %v828_v36 = vpop.permute.xlu1 %827  ;;  %v860_v55 = vmul.f32 %v857_v17, %v1351_v31  ;;  %v859_v58 = vmul.f32 %v855_v50, %v1348_v30 }
 0x1ec   : > { %v832_v37 = vpop.permute.xlu0 %831 }
 0x1ed   : > { %v837_v59 = vsel %vm514_vm3, %v832_v37, %v828_v36  ;;  %v835_v62 = vsel %vm514_vm3, %v828_v36, %v832_v37 }
 0x1ee   : > { %v808_v11 = vpop.permute.xlu1 %807  ;;  %v839_v6 = vmul.f32 %v835_v62, %v1355_v34 }
 0x1f0   : > { %v812_v38 = vpop.permute.xlu0 %811 }
 0x1f1   : > { %v817_v7 = vsel %vm489_vm1, %v812_v38, %v808_v11  ;;  %v815_v10 = vsel %vm489_vm1, %v808_v11, %v812_v38 }
 0x1f2   : > { %v784_v39 = vpop.permute.xlu1 %783  ;;  %v819_v22 = vmul.f32 %v815_v10, %v1340_v26 }
 0x1f4   : > { %v788_v42 = vpop.permute.xlu0 %787 }
 0x1f5   : > { %v791_v29 = vsel %vm462_vm5, %v784_v39, %v788_v42 }
 0x1f6   : > { %v1521_v43 = vpop.permute.xlu1 %763  ;;  %v796_v37 = vmul.f32 %v791_v29, %v1384_v56 }
 0x1f8   : > { %v1523_v44 = vpop.permute.xlu0 %767 }
 0x1fa   : > { %v1525_v45 = vpop.permute.xlu1 %743 }
 0x1fc   : > { %v1527_v46 = vpop.permute.xlu0 %747 }
 0x1fe   : > { %v850_v47 = vpop.permute.xlu1 %849 }
 0x200   : > { %v854_v16 = vpop.permute.xlu0 %853 }
 0x201   : > { %v856_v48 = vsel %vm533_vm2, %v850_v47, %v854_v16  ;;  %v858_v49 = vsel %vm533_vm2, %v854_v16, %v850_v47 }
 0x202   : > { %v830_v51 = vpop.permute.xlu1 %829  ;;  %v862_v52 = vmul.f32 %v858_v49, %v1351_v31  ;;  %v861_v54 = vmul.f32 %v856_v48, %v1348_v30  ;;  %v840_v30 = vmul.f32 %v837_v59, %v1358_v35  ;;  %v751_v48 = vsel %vm418_vm6, %v1525_v45, %v1527_v46 }
 0x204   : > { %v834_v57 = vpop.permute.xlu0 %833  ;;  %932 = vmatprep.subr.mxu1 %v862_v52 }
 0x205   : > { %v836_v60 = vsel %vm514_vm3, %v830_v51, %v834_v57  ;;  %v838_v61 = vsel %vm514_vm3, %v834_v57, %v830_v51  ;;  %933 = vmatpush1.msra.mxu1 %v861_v54  ;;  %v756_v51 = vmul.f32 %v751_v48, %v1401_v5 }
 0x206   : > { %v841_v63 = vmul.f32 %v836_v60, %v1355_v34  ;;  %v842_v31 = vmul.f32 %v838_v61, %v1358_v35  ;;  %934 = vmatprep.subr.mxu1 %v860_v55  ;;  %v810_v0 = vpop.permute.xlu1 %809  ;;  %v820_v34 = vmul.f32 %v817_v7, %v1343_v27 }
 0x207   : > { %935 = vmatpush1.msra.mxu1 %v859_v58 }
 0x208   : > { %v814_v3 = vpop.permute.xlu0 %813  ;;  %936 = vmatprep.subr.mxu1 %v842_v31 }
 0x209   : > { %v816_v8 = vsel %vm489_vm1, %v810_v0, %v814_v3  ;;  %v818_v9 = vsel %vm489_vm1, %v814_v3, %v810_v0  ;;  %937 = vmatpush1.msra.mxu1 %v841_v63 }
 0x20a   : > { %v821_v13 = vmul.f32 %v816_v8, %v1340_v26  ;;  %v822_v35 = vmul.f32 %v818_v9, %v1343_v27  ;;  %938 = vmatprep.subr.mxu1 %v840_v30  ;;  %v724_v15 = vpop.permute.xlu1 %723  ;;  %v793_v26 = vsel %vm462_vm5, %v788_v42, %v784_v39  ;;  %v720_v8 = vld [vmem:[%s1660_s5] sm:$0xff] }
 0x20b   : > { %939 = vmatpush1.msra.mxu1 %v839_v6  ;;  %v795_v38 = vmul.f32 %v793_v26, %v1379_v53 }
 0x20c   : > { %v728_v18 = vpop.permute.xlu0 %727  ;;  %940 = vmatprep.subr.mxu1 %v822_v35 }
 0x20d   : > { %941 = vmatpush1.msra.mxu1 %v821_v13  ;;  %v731_v55 = vsel %vm399_vm8, %v724_v15, %v728_v18 }
 0x20e   : > { %942 = vmatprep.subr.mxu1 %v820_v34  ;;  %v786_v23 = vpop.permute.xlu1 %785 }
 0x20f   : > { %943 = vmatpush1.msra.mxu1 %v819_v22 }
 0x210   : > { %v790_v28 = vpop.permute.xlu0 %789  ;;  %944 = vmatprep.subr.mxu1 %v1473_v25 }
 0x211   : > { %v792_v32 = vsel %vm462_vm5, %v786_v23, %v790_v28  ;;  %v794_v27 = vsel %vm462_vm5, %v790_v28, %v786_v23  ;;  %945 = vmatpush1.msra.mxu1 %v1469_v24  ;;  %v771_v24 = vsel %vm443_vm7, %v1521_v43, %v1523_v44 }
 0x212   : > { %v797_v33 = vmul.f32 %v794_v27, %v1379_v53  ;;  %v798_v36 = vmul.f32 %v792_v32, %v1384_v56  ;;  %946 = vmatprep.subr.mxu1 %v1445_v2  ;;  %v766_v25 = vpop.permute.xlu1 %765  ;;  %v773_v56 = vsel %vm443_vm7, %v1523_v44, %v1521_v43  ;;  %v776_v47 = vmul.f32 %v771_v24, %v1414_v21 }
 0x213   : > { %947 = vmatpush1.msra.mxu1 %v1443_v1  ;;  %v775_v17 = vmul.f32 %v773_v56, %v1409_v14 }
 0x214   : > { %v770_v11 = vpop.permute.xlu0 %769  ;;  %948 = vmatprep.subr.mxu1 %v798_v36 }
 0x215   : > { %v772_v39 = vsel %vm443_vm7, %v766_v25, %v770_v11  ;;  %v774_v2 = vsel %vm443_vm7, %v770_v11, %v766_v25  ;;  %949 = vmatpush1.msra.mxu1 %v797_v33 }
 0x216   : > { %v777_v1 = vmul.f32 %v774_v2, %v1409_v14  ;;  %v778_v53 = vmul.f32 %v772_v39, %v1414_v21  ;;  %950 = vmatprep.subr.mxu1 %v796_v37  ;;  %v746_v42 = vpop.permute.xlu1 %745  ;;  %v753_v21 = vsel %vm418_vm6, %v1527_v46, %v1525_v45  ;;  %v733_v46 = vsel %vm399_vm8, %v728_v18, %v724_v15 }
 0x217   : > { %951 = vmatpush1.msra.mxu1 %v795_v38  ;;  %v755_v54 = vmul.f32 %v753_v21, %v1398_v4  ;;  %v735_v61 = vmul.f32 %v733_v46, %v1425_v40 }
 0x218   : > { %v750_v16 = vpop.permute.xlu0 %749  ;;  %952 = vmatprep.subr.mxu1 %v778_v53 }
 0x219   : > { %v752_v43 = vsel %vm418_vm6, %v746_v42, %v750_v16  ;;  %v754_v44 = vsel %vm418_vm6, %v750_v16, %v746_v42  ;;  %953 = vmatpush1.msra.mxu1 %v777_v1 }
 0x21a   : > { %v757_v49 = vmul.f32 %v754_v44, %v1398_v4  ;;  %v758_v14 = vmul.f32 %v752_v43, %v1401_v5  ;;  %954 = vmatprep.subr.mxu1 %v776_v47  ;;  %v726_v50 = vpop.permute.xlu1 %725  ;;  %v736_v4 = vmul.f32 %v731_v55, %v1428_v41 }
 0x21b   : > { %955 = vmatpush1.msra.mxu1 %v775_v17 }
 0x21c   : > { %v730_v52 = vpop.permute.xlu0 %729  ;;  %956 = vmatprep.subr.mxu1 %v758_v14 }
 0x21d   : > { %v732_v57 = vsel %vm399_vm8, %v726_v50, %v730_v52  ;;  %v734_v45 = vsel %vm399_vm8, %v730_v52, %v726_v50  ;;  %957 = vmatpush1.msra.mxu1 %v757_v49 }
 0x21e   : > { %v737_v58 = vmul.f32 %v734_v45, %v1425_v40  ;;  %v738_v5 = vmul.f32 %v732_v57, %v1428_v41  ;;  %958 = vmatprep.subr.mxu1 %v756_v51  ;;  %v870_v59 = vpop.permute.xlu1 %869 }
 0x21f   : > { %959 = vmatpush1.msra.mxu1 %v755_v54 }
 0x220   : > { %v874_v60 = vpop.permute.xlu0 %873  ;;  %960 = vmatprep.subr.mxu1 %v738_v5 }
 0x221   : > { %v876_v62 = vsel %vm558_vm0, %v870_v59, %v874_v60  ;;  %v878_v63 = vsel %vm558_vm0, %v874_v60, %v870_v59  ;;  %961 = vmatpush1.msra.mxu1 %v737_v58 }
 0x222   : > { %v881_v31 = vmul.f32 %v1325_v19, %v876_v62  ;;  %v882_v0 = vmul.f32 %v1330_v20, %v878_v63  ;;  %962 = vmatprep.subr.mxu1 %v736_v4  ;;  %v868_v30 = vpop.permute.xlu1 %867 }
 0x223   : > { %963 = vmatpush1.msra.mxu1 %v735_v61 }
 0x224   : > { %v872_v41 = vpop.permute.xlu0 %871  ;;  %992 = vmatprep.subr.mxu1 %v882_v0 }
 0x225   : > { %v875_v40 = vsel %vm558_vm0, %v868_v30, %v872_v41  ;;  %v877_v3 = vsel %vm558_vm0, %v872_v41, %v868_v30  ;;  %993 = vmatpush2.msra.mxu1 %v881_v31 }
 0x226   : > { %v879_v6 = vmul.f32 %v1325_v19, %v875_v40  ;;  %v880_v7 = vmul.f32 %v1330_v20, %v877_v3 }
 0x228   : > { %994 = vmatprep.subr.mxu1 %v880_v7 }
 0x229   : > { %995 = vmatpush2.msra.mxu1 %v879_v6 }
 0x22a   : > { %997 = vmatmul.mubr.f32.vlgmr.msra.gmra.mxu1 %v720_v8 }
 0x22f   : > { %v926_v9 = vpop.permute.xlu1 %925 }
 0x2ea   : > { %v998_v12 = vpop.f32.mrf.mxu1 }
 0x2eb   : > { %v999_v10 = vadd.f32 %v998_v12, %v926_v9 }
 0x2ec   : > { %v1000_v13 = vpop.f32.mrf.mxu1 }
 0x2ed   : > { %1003 = vst [vmem:[%s372_s17] sm:$0xff] %v999_v10  ;;  %v1001_v19 = vadd.f32 %v1000_v13, %v926_v9 }
 0x2ef   : > { %1004 = vst [vmem:[%s372_s17 + $0x8] sm:$0xff] %v1001_v19  ;;  %v1005_v20 = vadd.f32 %v1001_v19, %v999_v10 }
 0x2f1   : > { %1006 = vadd.xlane.f32.xlu0 %v1005_v20 }
 0x37a   : > { %v1007_v35 = vpop.xlane.xlu0 %1006 }
 0x37b   : > { %v1009_v15 = vmul.f32 0.00390625, %v1007_v35 }
 0x37d   : > { %v1010_v34 = vsub.f32 %v999_v10, %v1009_v15  ;;  %v1011_v18 = vsub.f32 %v1001_v19, %v1009_v15  ;;  %1013 = vst.msk [vmem:[%s376_s28] sm:$0xff] %vm1012_vm11, %v1009_v15 }
 0x37f   : > { %v1014_v22 = vmul.f32 %v1010_v34, %v1010_v34  ;;  %v1015_v23 = vmul.f32 %v1011_v18, %v1011_v18 }
 0x381   : > { %v1016_v28 = vadd.f32 %v1015_v23, %v1014_v22 }
 0x383   : > { %1017 = vadd.xlane.f32.xlu1 %v1016_v28 }
 0x40c   : > { %v1018_v29 = vpop.xlane.xlu1 %1017 }
 0x40d   : > { %1019 = vst.msk [vmem:[%s380_s30] sm:$0xff] %vm1012_vm11, %v1018_v29 }
 0x40e PF: > { %s21_s13 = sadd.s32 1, %s1186_s13  }
 0x40f   : > { %p18_p4 = scmp.ge.s32.totalorder %s21_s13, 4  }
 0x411   :  { %20 = sbr.rel (!%p18_p4) target bundleno = 1 (0x1), region = 106 }

</bundles_post_ra>
